<compile_context>
chip_gen: v5e
topology: v5e:2x2
jax: 0.10.0
libtpu: 0.0.40
codegen_flags: <defaults>
</compile_context>

<pallas_src>
import jax
import jax.numpy as jnp
from jax.experimental import pallas as pl
from jax.experimental.pallas import tpu as pltpu

INPUT_DIM = 784     # mnist['data'].shape[-1]
HIDDEN_DIM = 512
OUT_DIM = 10

LANE = 128
BF16_SUBLANE = 16   # bf16 packs 16 rows per vreg sublane group

OUT_PAD = 128       # round_up(10, 128) -> lane-dense, unmasked output stores


def _round_up(n, m):
    return ((n + m - 1) // m) * m


def mlp_kernel(x_ref, w1_ref, b1_ref, w2_ref, b2_ref, o_ref, h_ref):
    # Layer 1: bf16 MXU inputs, f32 accumulation, f32 epilogue.
    x = x_ref[...].astype(jnp.bfloat16)          # no-op if x is already bf16
    h = jnp.dot(x, w1_ref[...], preferred_element_type=jnp.float32)
    h = jnp.maximum(h + b1_ref[...], 0.0)
    # Stage hidden activation in an explicit bf16 VMEM scratch so the second
    # matmul reads a well-laid-out LHS instead of spilled vregs.
    h_ref[...] = h.astype(jnp.bfloat16)
    # Layer 2: (tb, 512) @ (512, 128) -> lane-dense (tb, 128) output slab.
    o = jnp.dot(h_ref[...], w2_ref[...], preferred_element_type=jnp.float32)
    o_ref[...] = (o + b2_ref[...]).astype(o_ref.dtype)


def prepare_params(w1, b1, w2, b2):
    """One-time weight prep (cast/pad) hoisted out of the forward path."""
    w1b = w1.astype(jnp.bfloat16)                                   # (784, 512)
    b1f = jnp.reshape(b1, (1, HIDDEN_DIM)).astype(jnp.float32)      # (1, 512)
    w2p = jnp.zeros((HIDDEN_DIM, OUT_PAD), jnp.bfloat16)
    w2p = w2p.at[:, :OUT_DIM].set(w2.astype(jnp.bfloat16))          # (512, 128)
    b2p = jnp.zeros((1, OUT_PAD), jnp.float32)
    b2p = b2p.at[:, :OUT_DIM].set(
        jnp.reshape(b2, (1, OUT_DIM)).astype(jnp.float32))          # (1, 128)
    return (w1b, b1f, w2p, b2p)


def _pick_tile(B, tile_b):
    if B >= 2 * tile_b:
        return tile_b
    # Small/medium batches: aim for >= 2 grid steps so both v7x TensorCores
    # get work; round to 16 rows for bf16 sublane packing.
    return max(BF16_SUBLANE, _round_up(-(-B // 2), BF16_SUBLANE))


def mnist_mlp(x, params, *, tile_b=512):
    """x: (B, 784) float (f32 or bf16); params from prepare_params.
    Returns (B, 10) float32 logits."""
    w1b, b1f, w2p, b2p = params
    B, D = x.shape
    assert D == INPUT_DIM

    tb = _pick_tile(B, tile_b)
    Bp = _round_up(B, tb)
    # No padded copy of x in the common case (B % tb == 0); tiny zero-pad
    # of the batch dim otherwise.  Padded rows are sliced away below.
    x_in = x if Bp == B else jnp.pad(x, ((0, Bp - B), (0, 0)))

    grid = (Bp // tb,)

    itemsize = jnp.dtype(x.dtype).itemsize
    flops = 2 * Bp * (INPUT_DIM * HIDDEN_DIM + HIDDEN_DIM * OUT_PAD)
    bytes_accessed = (
        Bp * INPUT_DIM * itemsize                  # x stream
        + INPUT_DIM * HIDDEN_DIM * 2 + HIDDEN_DIM * 4   # w1, b1
        + HIDDEN_DIM * OUT_PAD * 2 + OUT_PAD * 4        # w2, b2
        + Bp * OUT_PAD * 2                         # bf16 output slab
    )

    out = pl.pallas_call(
        mlp_kernel,
        out_shape=jax.ShapeDtypeStruct((Bp, OUT_PAD), jnp.bfloat16),
        grid_spec=pltpu.PrefetchScalarGridSpec(
            num_scalar_prefetch=0,
            grid=grid,
            in_specs=[
                # x: tiled along batch; last dim 784 == full array dim (legal).
                pl.BlockSpec((tb, INPUT_DIM), lambda i: (i, 0)),
                # Weights / biases: constant index_map -> resident in VMEM.
                pl.BlockSpec((INPUT_DIM, HIDDEN_DIM), lambda i: (0, 0)),
                pl.BlockSpec((1, HIDDEN_DIM), lambda i: (0, 0)),
                pl.BlockSpec((HIDDEN_DIM, OUT_PAD), lambda i: (0, 0)),
                pl.BlockSpec((1, OUT_PAD), lambda i: (0, 0)),
            ],
            out_specs=pl.BlockSpec((tb, OUT_PAD), lambda i: (i, 0)),
            scratch_shapes=[pltpu.VMEM((tb, HIDDEN_DIM), jnp.bfloat16)],
        ),
        compiler_params=pltpu.CompilerParams(
            dimension_semantics=("parallel",),
            # Above the v5e 16 MiB scoped default; headroom for tile_b up to 1024.
            vmem_limit_bytes=32 * 1024 * 1024,
        ),
        cost_estimate=pl.CostEstimate(
            flops=flops, transcendentals=0, bytes_accessed=bytes_accessed
        ),
    )(x_in, w1b, b1f, w2p, b2p)

    # Strip batch / output-feature padding; return f32 logits (module semantics).
    return out[:B, :OUT_DIM].astype(jnp.float32)


def reference(x, w1, b1, w2, b2):
    h = jnp.maximum(x @ w1 + jnp.reshape(b1, (1, -1)), 0.0)
    return h @ w2 + jnp.reshape(b2, (1, -1))


if __name__ == "__main__":
    key = jax.random.PRNGKey(0)
    kx, kw1, kb1, kw2, kb2 = jax.random.split(key, 5)

    batch = 8  # small deterministic example batch
    x = jax.random.normal(kx, (batch, INPUT_DIM), dtype=jnp.float32)

    # Deterministic synthetic parameter init (stands in for the Linear layers'
    # random_state-driven init in the original script).
    w1 = jax.random.normal(kw1, (INPUT_DIM, HIDDEN_DIM), dtype=jnp.float32) * 0.05
    b1 = jax.random.normal(kb1, (1, HIDDEN_DIM), dtype=jnp.float32) * 0.01
    w2 = jax.random.normal(kw2, (HIDDEN_DIM, OUT_DIM), dtype=jnp.float32) * 0.05
    b2 = jax.random.normal(kb2, (1, OUT_DIM), dtype=jnp.float32) * 0.01

    params = prepare_params(w1, b1, w2, b2)   # one-time weight prep
    out = mnist_mlp(x, params)
    out = jax.block_until_ready(out)

    ref = reference(x, w1, b1, w2, b2)
    assert out.shape == (batch, OUT_DIM)
    # bf16 matmul inputs (K=784 reduction) + bf16 logits -> loose tolerance.
    assert jnp.allclose(out, ref, atol=2e-1, rtol=5e-2), float(
        jnp.max(jnp.abs(out - ref))
    )

    print("KERNEL_OK")
</pallas_src>

<mosaic_0001>
module attributes {stable_mosaic.version = 11 : i64} {
  func.func @mlp_kernel(%arg0: i32, %arg1: memref<16x784xf32, #tpu.memory_space<vmem>>, %arg2: memref<784x512xbf16, #tpu.memory_space<vmem>>, %arg3: memref<1x512xf32, #tpu.memory_space<vmem>>, %arg4: memref<512x128xbf16, #tpu.memory_space<vmem>>, %arg5: memref<1x128xf32, #tpu.memory_space<vmem>>, %arg6: memref<16x128xbf16, #tpu.memory_space<vmem>>, %arg7: memref<16x512xbf16, #tpu.memory_space<vmem>>) attributes {dimension_semantics = [#tpu.dimension_semantics<parallel>], iteration_bounds = array<i64: 1>, scalar_prefetch = 0 : i64, scratch_operands = 1 : i64, tpu.core_type = #tpu.core_type<tc>, window_params = [{transform_indices = @transform_0, window_bounds = array<i64: 16, 784>}, {pipeline_mode = #tpu.pipeline_mode<synchronous>, transform_indices = @transform_1, window_bounds = array<i64: 784, 512>}, {pipeline_mode = #tpu.pipeline_mode<synchronous>, transform_indices = @transform_2, window_bounds = array<i64: 1, 512>}, {pipeline_mode = #tpu.pipeline_mode<synchronous>, transform_indices = @transform_3, window_bounds = array<i64: 512, 128>}, {pipeline_mode = #tpu.pipeline_mode<synchronous>, transform_indices = @transform_4, window_bounds = array<i64: 1, 128>}, {transform_indices = @transform_5, window_bounds = array<i64: 16, 128>}]} {
    %c0 = arith.constant 0 : index
    %c0_0 = arith.constant 0 : index
    %0 = vector.load %arg1[%c0, %c0_0] : memref<16x784xf32, #tpu.memory_space<vmem>>, vector<16x784xf32>
    %1 = arith.truncf %0 : vector<16x784xf32> to vector<16x784xbf16>
    %c0_1 = arith.constant 0 : index
    %c0_2 = arith.constant 0 : index
    %2 = vector.load %arg2[%c0_1, %c0_2] : memref<784x512xbf16, #tpu.memory_space<vmem>>, vector<784x512xbf16>
    %cst = arith.constant dense<0.000000e+00> : vector<16x512xf32>
    %3 = tpu.matmul %1, %2, %cst {dimension_numbers = #tpu.dot_dimension_numbers<[1], [0], [0], [1], [0, 0, 1, 1], [], []>} : vector<16x784xbf16>, vector<784x512xbf16>, vector<16x512xf32> -> vector<16x512xf32>
    %c0_3 = arith.constant 0 : index
    %c0_4 = arith.constant 0 : index
    %4 = vector.load %arg3[%c0_3, %c0_4] : memref<1x512xf32, #tpu.memory_space<vmem>>, vector<1x512xf32>
    %5 = vector.broadcast %4 : vector<1x512xf32> to vector<16x512xf32>
    %6 = arith.addf %3, %5 : vector<16x512xf32>
    %cst_5 = arith.constant 0.000000e+00 : f32
    %7 = vector.broadcast %cst_5 : f32 to vector<16x512xf32>
    %8 = arith.maximumf %6, %7 : vector<16x512xf32>
    %9 = arith.truncf %8 : vector<16x512xf32> to vector<16x512xbf16>
    %c0_6 = arith.constant 0 : index
    %c0_7 = arith.constant 0 : index
    %10 = vector.load %arg7[%c0_6, %c0_7] : memref<16x512xbf16, #tpu.memory_space<vmem>>, vector<16x512xbf16>
    tpu.vector_store %arg7[%c0_6, %c0_7], %9 {strides = array<i32>} : memref<16x512xbf16, #tpu.memory_space<vmem>>, vector<16x512xbf16>,
    %c0_8 = arith.constant 0 : index
    %c0_9 = arith.constant 0 : index
    %11 = vector.load %arg7[%c0_8, %c0_9] : memref<16x512xbf16, #tpu.memory_space<vmem>>, vector<16x512xbf16>
    %c0_10 = arith.constant 0 : index
    %c0_11 = arith.constant 0 : index
    %12 = vector.load %arg4[%c0_10, %c0_11] : memref<512x128xbf16, #tpu.memory_space<vmem>>, vector<512x128xbf16>
    %cst_12 = arith.constant dense<0.000000e+00> : vector<16x128xf32>
    %13 = tpu.matmul %11, %12, %cst_12 {dimension_numbers = #tpu.dot_dimension_numbers<[1], [0], [0], [1], [0, 0, 1, 1], [], []>} : vector<16x512xbf16>, vector<512x128xbf16>, vector<16x128xf32> -> vector<16x128xf32>
    %c0_13 = arith.constant 0 : index
    %c0_14 = arith.constant 0 : index
    %14 = vector.load %arg5[%c0_13, %c0_14] : memref<1x128xf32, #tpu.memory_space<vmem>>, vector<1x128xf32>
    %15 = vector.broadcast %14 : vector<1x128xf32> to vector<16x128xf32>
    %16 = arith.addf %13, %15 : vector<16x128xf32>
    %17 = arith.truncf %16 : vector<16x128xf32> to vector<16x128xbf16>
    %c0_15 = arith.constant 0 : index
    %c0_16 = arith.constant 0 : index
    %18 = vector.load %arg6[%c0_15, %c0_16] : memref<16x128xbf16, #tpu.memory_space<vmem>>, vector<16x128xbf16>
    tpu.vector_store %arg6[%c0_15, %c0_16], %17 {strides = array<i32>} : memref<16x128xbf16, #tpu.memory_space<vmem>>, vector<16x128xbf16>,
    return
  }
  func.func @transform_0(%arg0: i32) -> (i32, i32) {
    %c0_i32 = arith.constant 0 : i32
    %c0_i32_0 = arith.constant 0 : i32
    return %arg0, %c0_i32 : i32, i32
  }
  func.func @transform_1(%arg0: i32) -> (i32, i32) {
    %c0_i32 = arith.constant 0 : i32
    %c0_i32_0 = arith.constant 0 : i32
    %c0_i32_1 = arith.constant 0 : i32
    return %c0_i32, %c0_i32_0 : i32, i32
  }
  func.func @transform_2(%arg0: i32) -> (i32, i32) {
    %c0_i32 = arith.constant 0 : i32
    %c0_i32_0 = arith.constant 0 : i32
    %c0_i32_1 = arith.constant 0 : i32
    return %c0_i32, %c0_i32_0 : i32, i32
  }
  func.func @transform_3(%arg0: i32) -> (i32, i32) {
    %c0_i32 = arith.constant 0 : i32
    %c0_i32_0 = arith.constant 0 : i32
    %c0_i32_1 = arith.constant 0 : i32
    return %c0_i32, %c0_i32_0 : i32, i32
  }
  func.func @transform_4(%arg0: i32) -> (i32, i32) {
    %c0_i32 = arith.constant 0 : i32
    %c0_i32_0 = arith.constant 0 : i32
    %c0_i32_1 = arith.constant 0 : i32
    return %c0_i32, %c0_i32_0 : i32, i32
  }
  func.func @transform_5(%arg0: i32) -> (i32, i32) {
    %c0_i32 = arith.constant 0 : i32
    %c0_i32_0 = arith.constant 0 : i32
    return %arg0, %c0_i32 : i32, i32
  }
}

</mosaic_0001>

<bundles_post_ra>
// kernel: tpu_custom_call.1
= control target key start
LH: loop header
LB: loop body
LE: loop exit
PB: predicated region body
PF: predicated region fallthrough
CT: control target
= control target key end

     0   :  { %10 = vsyncpa [#allocation4], 0  ;;  %s3514_s0 = inlined_call_operand.hbm [shape: f32[16,784], index: 0, kind: input, shape index: {}]   ;;  %s3515_s1 = inlined_call_operand.hbm [shape: bf16[784,512], index: 1, kind: input, shape index: {}]   ;;  %s3516_s2 = inlined_call_operand.hbm [shape: f32[1,512], index: 2, kind: input, shape index: {}]   ;;  %s3517_s3 = inlined_call_operand.hbm [shape: bf16[512,128], index: 3, kind: input, shape index: {}]   ;;  %s3518_s4 = inlined_call_operand.vmem [shape: f32[1,128], index: 4, kind: input, shape index: {}]   ;;  %s3519_s5 = inlined_call_operand.hbm [shape: bf16[16,128], index: 5, kind: output, shape index: {}]  }
   0x1   :  { %11 = vsyncpa [#allocation7], 0 }
   0x2   :  { %12 = vsyncpa [#allocation10], 0  ;;  %s31_s20 = sshll.u32 %s3515_s1, 4  ;;  %s32_s20 = int_to_ptr.hbm [resolvable:$true] %s31_s20 }
   0x3   :  { %13 = vsyncpa [#allocation5], 0  ;;  %s3376_s21 = smov [#allocation6]   ;;  %s18_s25 = sshll.u32 %s3514_s0, 4  ;;  %s19_s25 = int_to_ptr.hbm [resolvable:$true] %s18_s25 }
   0x4   :  { %s33_s22 = sshll.u32 %s3376_s21, 4  ;;  %s3377_s26 = smov 256   ;;  %s34_s22 = int_to_ptr.vmem [resolvable:$true] %s33_s22 }
   0x5   :  { %s3378_s27 = smov 16   ;;  %s3379_s28 = smov [#allocation3]  }
   0x6   :  { %39 = dma.hbm_to_vmem [thread:$0]  %s32_s20, 25088, %s34_s22, [#allocation7], %s3377_s26, %s3377_s26, %s3378_s27  }
   0x7   :  { %s20_s29 = sshll.u32 %s3379_s28, 4  ;;  %s3380_s30 = smov 896   ;;  %s21_s29 = int_to_ptr.vmem [resolvable:$true] %s20_s29 }
   0x8   :  { %s3381_s6 = smov 56   ;;  %s45_s8 = sshll.u32 %s3516_s2, 4  ;;  %s46_s8 = int_to_ptr.hbm [resolvable:$true] %s45_s8 }
   0x9   :  { %26 = dma.hbm_to_vmem [thread:$0]  %s19_s25, 1792, %s21_s29, [#allocation4], %s3380_s30, %s3380_s30, %s3381_s6  }
   0xa   :  { %s3382_s9 = smov [#allocation8]   ;;  %s55_s12 = sshll.u32 %s3517_s3, 4  ;;  %s56_s12 = int_to_ptr.hbm [resolvable:$true] %s55_s12 }
   0xb   :  { %s47_s10 = sshll.u32 %s3382_s9, 4  ;;  %s3383_s13 = smov [#allocation9]   ;;  %s48_s10 = int_to_ptr.vmem [resolvable:$true] %s47_s10 }
   0xc   :  { %50 = dma.hbm_to_vmem [thread:$0]  %s46_s8, 64, %s48_s10, [#allocation7]  }
   0xd   :  { %s57_s14 = sshll.u32 %s3383_s13, 4  ;;  %s3384_s15 = smov 64   ;;  %s58_s14 = int_to_ptr.vmem [resolvable:$true] %s57_s14 }
   0xe   :  { %s3385_s16 = smov 4  }
   0xf   :  { %63 = dma.hbm_to_vmem [thread:$0]  %s56_s12, 4096, %s58_s14, [#allocation10], %s3384_s15, %s3384_s15, %s3385_s16  }
  0x10   :  { %3368 = dma.done.wait [#allocation4], 1792  }
  0x11   :  { %3369 = vsyncadd [#allocation4], 4294965504 }
  0x12   :  { %3370 = dma.done.wait [#allocation7], 25152  }
  0x13   :  { %3371 = vsyncadd [#allocation7], 4294942144 }
  0x14   :  { %3372 = dma.done.wait [#allocation10], 4096  }
  0x15   :  { %3373 = vsyncadd [#allocation10], 4294963200  ;;  %v2181_v0 = vld [vmem:[#allocation6 + $0xe0] sm:$0xf]  ;;  %v3029_v1 = vld [vmem:[#allocation6 + $0xec] sm:$0xf0] }
  0x16   :  { %v2309_v2 = vld [vmem:[#allocation6 + $0x1e0] sm:$0xf]  ;;  %v2182_v3 = vor.u32 %v3029_v1, %v2181_v0  ;;  %v3061_v4 = vld [vmem:[#allocation6 + $0x1ec] sm:$0xf0]  ;;  %vm1290_vm0 = vcmask 130048   ;;  %s3386_s17 = smov [#allocation11]  }
  0x17   :  { %v2437_v5 = vld [vmem:[#allocation6 + $0x2e0] sm:$0xf]  ;;  %v3093_v6 = vld [vmem:[#allocation6 + $0x2ec] sm:$0xf0]  ;;  %v2310_v7 = vor.u32 %v3061_v4, %v2309_v2  ;;  %s2050_s18 = sshll.u32 %s3386_s17, 4  ;;  %s2052_s21 = sshll.u32 %s3519_s5, 4  ;;  %s2051_s18 = int_to_ptr.vmem [resolvable:$true] %s2050_s18  ;;  %s2053_s21 = int_to_ptr.hbm [resolvable:$true] %s2052_s21 }
  0x18   :  { %v2438_v8 = vor.u32 %v3093_v6, %v2437_v5  ;;  %v2565_v9 = vld [vmem:[#allocation6 + $0x3e0] sm:$0xf]  ;;  %v3125_v10 = vld [vmem:[#allocation6 + $0x3ec] sm:$0xf0]  ;;  %1294 = vmatpush.bf16.msra.mxu0 %v2182_v3 }
  0x19   :  { %v2165_v11 = vld [vmem:[#allocation6 + $0xc0] sm:$0xf]  ;;  %v2566_v12 = vor.u32 %v3125_v10, %v2565_v9  ;;  %v3025_v13 = vld [vmem:[#allocation6 + $0xcc] sm:$0xf0]  ;;  %1308 = vmatpush.bf16.msra.mxu1 %v2310_v7 }
  0x1a   :  { %v2293_v14 = vld [vmem:[#allocation6 + $0x1c0] sm:$0xf]  ;;  %v3057_v15 = vld [vmem:[#allocation6 + $0x1cc] sm:$0xf0]  ;;  %1322 = vmatpush.bf16.msra.mxu2 %v2438_v8  ;;  %v2166_v16 = vor.u32 %v3025_v13, %v2165_v11 }
  0x1b   :  { %v2294_v17 = vor.u32 %v3057_v15, %v2293_v14  ;;  %v2421_v18 = vld [vmem:[#allocation6 + $0x2c0] sm:$0xf]  ;;  %v3089_v19 = vld [vmem:[#allocation6 + $0x2cc] sm:$0xf0]  ;;  %1336 = vmatpush.bf16.msra.mxu3 %v2566_v12 }
  0x1c   :  { %v2549_v20 = vld [vmem:[#allocation6 + $0x3c0] sm:$0xf]  ;;  %v2422_v21 = vor.u32 %v3089_v19, %v2421_v18  ;;  %v3121_v22 = vld [vmem:[#allocation6 + $0x3cc] sm:$0xf0]  ;;  %1295 = vmatpush.bf16.msra.mxu0 %v2166_v16 }
  0x1d   :  { %v2149_v23 = vld [vmem:[#allocation6 + $0xa0] sm:$0xf]  ;;  %v3021_v24 = vld [vmem:[#allocation6 + $0xac] sm:$0xf0]  ;;  %v2550_v25 = vor.u32 %v3121_v22, %v2549_v20  ;;  %1309 = vmatpush.bf16.msra.mxu1 %v2294_v17 }
  0x1e   :  { %v2277_v26 = vld [vmem:[#allocation6 + $0x1a0] sm:$0xf]  ;;  %v3053_v27 = vld [vmem:[#allocation6 + $0x1ac] sm:$0xf0]  ;;  %v2150_v29 = vor.u32 %v3021_v24, %v2149_v23  ;;  %1323 = vmatpush.bf16.msra.mxu2 %v2422_v21 }
  0x1f   :  { %v2405_v28 = vld [vmem:[#allocation6 + $0x2a0] sm:$0xf]  ;;  %v3085_v30 = vld [vmem:[#allocation6 + $0x2ac] sm:$0xf0]  ;;  %v2278_v33 = vor.u32 %v3053_v27, %v2277_v26  ;;  %1337 = vmatpush.bf16.msra.mxu3 %v2550_v25 }
  0x20   :  { %v2533_v31 = vld [vmem:[#allocation6 + $0x3a0] sm:$0xf]  ;;  %v3117_v32 = vld [vmem:[#allocation6 + $0x3ac] sm:$0xf0]  ;;  %v2406_v34 = vor.u32 %v3085_v30, %v2405_v28  ;;  %1296 = vmatpush.bf16.msra.mxu0 %v2150_v29 }
  0x21   :  { %v2133_v35 = vld [vmem:[#allocation6 + $0x80] sm:$0xf]  ;;  %v3017_v36 = vld [vmem:[#allocation6 + $0x8c] sm:$0xf0]  ;;  %v2534_v38 = vor.u32 %v3117_v32, %v2533_v31  ;;  %1310 = vmatpush.bf16.msra.mxu1 %v2278_v33  ;;  %v3027_v32 = vld [vmem:[#allocation6 + $0xe4] sm:$0xf] }
  0x22   :  { %v2261_v37 = vld [vmem:[#allocation6 + $0x180] sm:$0xf]  ;;  %v3049_v39 = vld [vmem:[#allocation6 + $0x18c] sm:$0xf0]  ;;  %v2134_v44 = vor.u32 %v3017_v36, %v2133_v35  ;;  %1324 = vmatpush.bf16.msra.mxu2 %v2406_v34  ;;  %v2183_v33 = vld [vmem:[#allocation6 + $0xf0] sm:$0xf0] }
  0x23   :  { %v2389_v40 = vld [vmem:[#allocation6 + $0x280] sm:$0xf]  ;;  %v3081_v41 = vld [vmem:[#allocation6 + $0x28c] sm:$0xf0]  ;;  %v2262_v45 = vor.u32 %v3049_v39, %v2261_v37  ;;  %1338 = vmatpush.bf16.msra.mxu3 %v2534_v38  ;;  %v92_v36 = vld [vmem:[#allocation3 + $0x48] sm:$0xff] }
  0x24   :  { %v2517_v42 = vld [vmem:[#allocation6 + $0x380] sm:$0xf]  ;;  %v3113_v43 = vld [vmem:[#allocation6 + $0x38c] sm:$0xf0]  ;;  %v2390_v46 = vor.u32 %v3081_v41, %v2389_v40  ;;  %1297 = vmatpush.bf16.msra.mxu0 %v2134_v44  ;;  %v3059_v41 = vld [vmem:[#allocation6 + $0x1e4] sm:$0xf] }
  0x25   :  { %v2117_v47 = vld [vmem:[#allocation6 + $0x60] sm:$0xf]  ;;  %v3013_v48 = vld [vmem:[#allocation6 + $0x6c] sm:$0xf0]  ;;  %v2518_v50 = vor.u32 %v3113_v43, %v2517_v42  ;;  %1311 = vmatpush.bf16.msra.mxu1 %v2262_v45  ;;  %v90_v43 = vld [vmem:[#allocation3 + $0x38] sm:$0xff] }
  0x26   :  { %v2245_v49 = vld [vmem:[#allocation6 + $0x160] sm:$0xf]  ;;  %v3045_v51 = vld [vmem:[#allocation6 + $0x16c] sm:$0xf0]  ;;  %v2118_v56 = vor.u32 %v3013_v48, %v2117_v47  ;;  %1325 = vmatpush.bf16.msra.mxu2 %v2390_v46  ;;  %v2311_v46 = vld [vmem:[#allocation6 + $0x1f0] sm:$0xf0] }
  0x27   :  { %v2373_v52 = vld [vmem:[#allocation6 + $0x260] sm:$0xf]  ;;  %v3077_v53 = vld [vmem:[#allocation6 + $0x26c] sm:$0xf0]  ;;  %v2246_v57 = vor.u32 %v3045_v51, %v2245_v49  ;;  %1339 = vmatpush.bf16.msra.mxu3 %v2518_v50  ;;  %v86_v47 = vld [vmem:[#allocation3 + $0x18] sm:$0xff]  ;;  %v2186_v50 = vor.u32 %v3027_v32, %v2183_v33 }
  0x28   :  { %v2501_v54 = vld [vmem:[#allocation6 + $0x360] sm:$0xf]  ;;  %v3109_v55 = vld [vmem:[#allocation6 + $0x36c] sm:$0xf0]  ;;  %v2374_v58 = vor.u32 %v3077_v53, %v2373_v52  ;;  %1298 = vmatpush.bf16.msra.mxu0 %v2118_v56 }
  0x29   :  { %v2101_v59 = vld [vmem:[#allocation6 + $0x40] sm:$0xf]  ;;  %v3009_v60 = vld [vmem:[#allocation6 + $0x4c] sm:$0xf0]  ;;  %v2502_v62 = vor.u32 %v3109_v55, %v2501_v54  ;;  %1312 = vmatpush.bf16.msra.mxu1 %v2246_v57  ;;  %v3023_v57 = vld [vmem:[#allocation6 + $0xc4] sm:$0xf] }
  0x2a   :  { %v2229_v61 = vld [vmem:[#allocation6 + $0x140] sm:$0xf]  ;;  %v3041_v63 = vld [vmem:[#allocation6 + $0x14c] sm:$0xf0]  ;;  %v2102_v4 = vor.u32 %v3009_v60, %v2101_v59  ;;  %1326 = vmatpush.bf16.msra.mxu2 %v2374_v58  ;;  %v2167_v58 = vld [vmem:[#allocation6 + $0xd0] sm:$0xf0] }
  0x2b   :  { %v2357_v0 = vld [vmem:[#allocation6 + $0x240] sm:$0xf]  ;;  %v3073_v1 = vld [vmem:[#allocation6 + $0x24c] sm:$0xf0]  ;;  %v2230_v6 = vor.u32 %v3041_v63, %v2229_v61  ;;  %1340 = vmatpush.bf16.msra.mxu3 %v2502_v62  ;;  %v84_v61 = vld [vmem:[#allocation3 + $0x8] sm:$0xff]  ;;  %v2314_v63 = vor.u32 %v3059_v41, %v2311_v46 }
  0x2c   :  { %v2485_v2 = vld [vmem:[#allocation6 + $0x340] sm:$0xf]  ;;  %v3105_v3 = vld [vmem:[#allocation6 + $0x34c] sm:$0xf0]  ;;  %v2358_v7 = vor.u32 %v3073_v1, %v2357_v0  ;;  %1299 = vmatpush.bf16.msra.mxu0 %v2102_v4  ;;  %v3055_v1 = vld [vmem:[#allocation6 + $0x1c4] sm:$0xf]  ;;  %v2170_v4 = vor.u32 %v3023_v57, %v2167_v58 }
  0x2d   :  { %v2085_v5 = vld [vmem:[#allocation6 + $0x20] sm:$0xf]  ;;  %v3005_v8 = vld [vmem:[#allocation6 + $0x2c] sm:$0xf0]  ;;  %v2486_v11 = vor.u32 %v3105_v3, %v2485_v2  ;;  %1313 = vmatpush.bf16.msra.mxu1 %v2230_v6  ;;  %v2295_v2 = vld [vmem:[#allocation6 + $0x1d0] sm:$0xf0] }
  0x2e   :  { %v2213_v9 = vld [vmem:[#allocation6 + $0x120] sm:$0xf]  ;;  %v3037_v10 = vld [vmem:[#allocation6 + $0x12c] sm:$0xf0]  ;;  %v2086_v18 = vor.u32 %v3005_v8, %v2085_v5  ;;  %1327 = vmatpush.bf16.msra.mxu2 %v2358_v7  ;;  %v2247_v41 = vld [vmem:[#allocation6 + $0x170] sm:$0xf0] }
  0x2f   :  { %v2341_v12 = vld [vmem:[#allocation6 + $0x220] sm:$0xf]  ;;  %v3069_v13 = vld [vmem:[#allocation6 + $0x22c] sm:$0xf0]  ;;  %v2214_v23 = vor.u32 %v3037_v10, %v2213_v9  ;;  %1341 = vmatpush.bf16.msra.mxu3 %v2486_v11  ;;  %v3019_v10 = vld [vmem:[#allocation6 + $0xa4] sm:$0xf] }
  0x30   :  { %v2469_v14 = vld [vmem:[#allocation6 + $0x320] sm:$0xf]  ;;  %v3101_v15 = vld [vmem:[#allocation6 + $0x32c] sm:$0xf0]  ;;  %v2342_v24 = vor.u32 %v3069_v13, %v2341_v12  ;;  %1300 = vmatpush.bf16.msra.mxu0 %v2086_v18  ;;  %v2151_v11 = vld [vmem:[#allocation6 + $0xb0] sm:$0xf0]  ;;  %v2298_v12 = vor.u32 %v3055_v1, %v2295_v2 }
  0x31   :  { %v2069_v16 = vld [vmem:[#allocation6] sm:$0xf]  ;;  %v3001_v17 = vld [vmem:[#allocation6 + $0xc] sm:$0xf0]  ;;  %v2470_v28 = vor.u32 %v3101_v15, %v2469_v14  ;;  %1314 = vmatpush.bf16.msra.mxu1 %v2214_v23  ;;  %v3051_v14 = vld [vmem:[#allocation6 + $0x1a4] sm:$0xf] }
  0x32   :  { %v2197_v19 = vld [vmem:[#allocation6 + $0x100] sm:$0xf]  ;;  %v3033_v20 = vld [vmem:[#allocation6 + $0x10c] sm:$0xf0]  ;;  %v2070_v35 = vor.u32 %v3001_v17, %v2069_v16  ;;  %1328 = vmatpush.bf16.msra.mxu2 %v2342_v24  ;;  %v2279_v15 = vld [vmem:[#allocation6 + $0x1b0] sm:$0xf0]  ;;  %v2154_v17 = vor.u32 %v3019_v10, %v2151_v11 }
  0x33   :  { %v2325_v21 = vld [vmem:[#allocation6 + $0x200] sm:$0xf]  ;;  %v3065_v22 = vld [vmem:[#allocation6 + $0x20c] sm:$0xf0]  ;;  %v2198_v39 = vor.u32 %v3033_v20, %v2197_v19  ;;  %1342 = vmatpush.bf16.msra.mxu3 %v2470_v28  ;;  %v2135_v23 = vld [vmem:[#allocation6 + $0x90] sm:$0xf0]  ;;  %v2282_v24 = vor.u32 %v3051_v14, %v2279_v15 }
  0x34   :  { %v2453_v25 = vld [vmem:[#allocation6 + $0x300] sm:$0xf]  ;;  %v3097_v26 = vld [vmem:[#allocation6 + $0x30c] sm:$0xf0]  ;;  %v2326_v40 = vor.u32 %v3065_v22, %v2325_v21  ;;  %1301 = vmatpush.bf16.msra.mxu0 %v2070_v35  ;;  %v3015_v22 = vld [vmem:[#allocation6 + $0x84] sm:$0xf] }
  0x35   :  { %v2693_v27 = vld [vmem:[#allocation6 + $0x4e0] sm:$0xf]  ;;  %v3157_v29 = vld [vmem:[#allocation6 + $0x4ec] sm:$0xf0]  ;;  %v2454_v44 = vor.u32 %v3097_v26, %v2453_v25  ;;  %1315 = vmatpush.bf16.msra.mxu1 %v2198_v39  ;;  %v3047_v26 = vld [vmem:[#allocation6 + $0x184] sm:$0xf] }
  0x36   :  { %v2821_v30 = vld [vmem:[#allocation6 + $0x5e0] sm:$0xf]  ;;  %v3189_v31 = vld [vmem:[#allocation6 + $0x5ec] sm:$0xf0]  ;;  %v2694_v45 = vor.u32 %v3157_v29, %v2693_v27  ;;  %1329 = vmatpush.bf16.msra.mxu2 %v2326_v40  ;;  %v2263_v27 = vld [vmem:[#allocation6 + $0x190] sm:$0xf0]  ;;  %v2138_v29 = vor.u32 %v3015_v22, %v2135_v23 }
  0x37   :  { %v85_v34 = vld [vmem:[#allocation3 + $0x10] sm:$0xff]  ;;  %v3193_v38 = vld [vmem:[#allocation6 + $0x60c] sm:$0xf0]  ;;  %v2822_v49 = vor.u32 %v3189_v31, %v2821_v30  ;;  %1343 = vmatpush.bf16.msra.mxu3 %v2454_v44  ;;  %v2119_v35 = vld [vmem:[#allocation6 + $0x70] sm:$0xf0] }
  0x38   :  { %v2837_v37 = vld [vmem:[#allocation6 + $0x600] sm:$0xf]  ;;  %v83_v42 = vld [vmem:[#allocation3] sm:$0xff]  ;;  %v3432_v54 = vpack.c.bf16 %v92_v36, %v85_v34  ;;  %1350 = vmatpush.bf16.msrb.mxu0 %v2694_v45  ;;  %v3011_v34 = vld [vmem:[#allocation6 + $0x64] sm:$0xf] }
  0x39   :  { %v93_v48 = vld [vmem:[#allocation3 + $0x50] sm:$0xff]  ;;  %v3153_v52 = vld [vmem:[#allocation6 + $0x4cc] sm:$0xf0]  ;;  %v3434_v55 = vpack.c.bf16 %v90_v43, %v83_v42  ;;  %v2838_v59 = vor.u32 %v3193_v38, %v2837_v37  ;;  %1364 = vmatpush.bf16.msrb.mxu1 %v2822_v49  ;;  %v96_v37 = vld [vmem:[#allocation3 + $0x68] sm:$0xff]  ;;  %v2266_v38 = vor.u32 %v3047_v26, %v2263_v27  ;;  %v2122_v43 = vor.u32 %v3011_v34, %v2119_v35 }
  0x3a   :  { %v2677_v51 = vld [vmem:[#allocation6 + $0x4c0] sm:$0xf]  ;;  %v3185_v56 = vld [vmem:[#allocation6 + $0x5cc] sm:$0xf0]  ;;  %v3436_v60 = vpack.c.bf16 %v93_v48, %v86_v47  ;;  %1330 = vmatmul.bf16.vlgmr.msra.gmra.mxu2 %v3432_v54  ;;  %v3043_v40 = vld [vmem:[#allocation6 + $0x164] sm:$0xf] }
  0x3b   :  { %v2805_v53 = vld [vmem:[#allocation6 + $0x5c0] sm:$0xf]  ;;  %v91_v62 = vld [vmem:[#allocation3 + $0x40] sm:$0xff]  ;;  %v2678_v0 = vor.u32 %v3153_v52, %v2677_v51  ;;  %1392 = vmatpush.bf16.msrb.mxu3 %v2186_v50  ;;  %1302 = vmatmul.bf16.vlgmr.msra.gmra.mxu0 %v3434_v55  ;;  %v3007_v48 = vld [vmem:[#allocation6 + $0x44] sm:$0xf]  ;;  %v2250_v51 = vor.u32 %v3043_v40, %v2247_v41 }
  0x3c   :  { %v2806_v3 = vor.u32 %v3185_v56, %v2805_v53  ;;  %v2661_v5 = vld [vmem:[#allocation6 + $0x4a0] sm:$0xf]  ;;  %v3149_v6 = vld [vmem:[#allocation6 + $0x4ac] sm:$0xf0]  ;;  %v3440_v8 = vpack.c.bf16 %v91_v62, %v84_v61  ;;  %1385 = vmatpush.bf16.msrb.mxu2 %v2838_v59  ;;  %1344 = vmatmul.bf16.vlgmr.msra.gmra.mxu3 %v3436_v60  ;;  %v2103_v49 = vld [vmem:[#allocation6 + $0x50] sm:$0xf0] }
  0x3d   :  { %v2789_v7 = vld [vmem:[#allocation6 + $0x5a0] sm:$0xf]  ;;  %v3181_v9 = vld [vmem:[#allocation6 + $0x5ac] sm:$0xf0]  ;;  %1351 = vmatpush.bf16.msrb.mxu0 %v2678_v0  ;;  %v2662_v13 = vor.u32 %v3149_v6, %v2661_v5  ;;  %v3039_v53 = vld [vmem:[#allocation6 + $0x144] sm:$0xf]  ;;  %v2106_v58 = vor.u32 %v3007_v48, %v2103_v49 }
  0x3e   :  { %1365 = vmatpush.bf16.msrb.mxu1 %v2806_v3  ;;  %v2790_v16 = vor.u32 %v3181_v9, %v2789_v7  ;;  %v2645_v18 = vld [vmem:[#allocation6 + $0x480] sm:$0xf]  ;;  %v3145_v19 = vld [vmem:[#allocation6 + $0x48c] sm:$0xf0]  ;;  %v2231_v56 = vld [vmem:[#allocation6 + $0x150] sm:$0xf0] }
  0x3f   :  { %1393 = vmatpush.bf16.msrb.mxu3 %v2170_v4  ;;  %v2773_v20 = vld [vmem:[#allocation6 + $0x580] sm:$0xf]  ;;  %1316 = vmatmul.bf16.vlgmr.msra.gmra.mxu1 %v3440_v8  ;;  %v3177_v21 = vld [vmem:[#allocation6 + $0x58c] sm:$0xf0]  ;;  %v2646_v25 = vor.u32 %v3145_v19, %v2645_v18  ;;  %v3003_v0 = vld [vmem:[#allocation6 + $0x24] sm:$0xf]  ;;  %v2234_v4 = vor.u32 %v3039_v53, %v2231_v56 }
  0x40   :  { %1406 = vmatpush.bf16.msra.mxu2 %v2314_v63  ;;  %v2774_v28 = vor.u32 %v3177_v21, %v2773_v20  ;;  %v2629_v30 = vld [vmem:[#allocation6 + $0x460] sm:$0xf]  ;;  %v3141_v31 = vld [vmem:[#allocation6 + $0x46c] sm:$0xf0]  ;;  %v2087_v1 = vld [vmem:[#allocation6 + $0x30] sm:$0xf0] }
  0x41   :  { %1352 = vmatpush.bf16.msrb.mxu0 %v2662_v13  ;;  %v2757_v32 = vld [vmem:[#allocation6 + $0x560] sm:$0xf]  ;;  %v3173_v33 = vld [vmem:[#allocation6 + $0x56c] sm:$0xf0]  ;;  %v2630_v39 = vor.u32 %v3141_v31, %v2629_v30  ;;  %v3035_v2 = vld [vmem:[#allocation6 + $0x124] sm:$0xf]  ;;  %v2090_v11 = vor.u32 %v3003_v0, %v2087_v1 }
  0x42   :  { %1366 = vmatpush.bf16.msrb.mxu1 %v2790_v16  ;;  %v89_v36 = vld [vmem:[#allocation3 + $0x30] sm:$0xff]  ;;  %v2758_v42 = vor.u32 %v3173_v33, %v2757_v32  ;;  %v3137_v45 = vld [vmem:[#allocation6 + $0x44c] sm:$0xf0]  ;;  %v2215_v3 = vld [vmem:[#allocation6 + $0x130] sm:$0xf0] }
  0x43   :  { %1394 = vmatpush.bf16.msrb.mxu3 %v2154_v17  ;;  %v2613_v44 = vld [vmem:[#allocation6 + $0x440] sm:$0xf]  ;;  %v3169_v47 = vld [vmem:[#allocation6 + $0x54c] sm:$0xf0]  ;;  %v3444_v50 = vpack.c.bf16 %v96_v37, %v89_v36  ;;  %v2999_v13 = vld [vmem:[#allocation6 + $0x4] sm:$0xf]  ;;  %v2218_v21 = vor.u32 %v3035_v2, %v2215_v3 }
  0x44   :  { %1407 = vmatpush.bf16.msra.mxu2 %v2298_v12  ;;  %v2741_v46 = vld [vmem:[#allocation6 + $0x540] sm:$0xf]  ;;  %v2614_v52 = vor.u32 %v3137_v45, %v2613_v44  ;;  %v3133_v61 = vld [vmem:[#allocation6 + $0x42c] sm:$0xf0]  ;;  %v2071_v14 = vld [vmem:[#allocation6 + $0x10] sm:$0xf0] }
  0x45   :  { %1353 = vmatpush.bf16.msrb.mxu0 %v2646_v25  ;;  %v2742_v57 = vor.u32 %v3169_v47, %v2741_v46  ;;  %v2597_v59 = vld [vmem:[#allocation6 + $0x420] sm:$0xf]  ;;  %v3165_v63 = vld [vmem:[#allocation6 + $0x52c] sm:$0xf0]  ;;  %v3091_v15 = vld [vmem:[#allocation6 + $0x2e4] sm:$0xf]  ;;  %v2074_v27 = vor.u32 %v2999_v13, %v2071_v14 }
  0x46   :  { %1367 = vmatpush.bf16.msrb.mxu1 %v2774_v28  ;;  %v2725_v62 = vld [vmem:[#allocation6 + $0x520] sm:$0xf]  ;;  %v2598_v5 = vor.u32 %v3133_v61, %v2597_v59  ;;  %v3129_v7 = vld [vmem:[#allocation6 + $0x40c] sm:$0xf0]  ;;  %v2439_v16 = vld [vmem:[#allocation6 + $0x2f0] sm:$0xf0] }
  0x47   :  { %1395 = vmatpush.bf16.msrb.mxu3 %v2138_v29  ;;  %v2581_v6 = vld [vmem:[#allocation6 + $0x400] sm:$0xf]  ;;  %v2726_v10 = vor.u32 %v3165_v63, %v2725_v62  ;;  %v3161_v12 = vld [vmem:[#allocation6 + $0x50c] sm:$0xf0]  ;;  %v3123_v17 = vld [vmem:[#allocation6 + $0x3e4] sm:$0xf]  ;;  %v2442_v31 = vor.u32 %v3091_v15, %v2439_v16 }
  0x48   :  { %1408 = vmatpush.bf16.msra.mxu2 %v2282_v24  ;;  %v2709_v9 = vld [vmem:[#allocation6 + $0x500] sm:$0xf]  ;;  %v2567_v18 = vld [vmem:[#allocation6 + $0x3f0] sm:$0xf0]  ;;  %v3155_v19 = vld [vmem:[#allocation6 + $0x4e4] sm:$0xf]  ;;  %v2582_v22 = vor.u32 %v3129_v7, %v2581_v6 }
  0x49   :  { %1354 = vmatpush.bf16.msrb.mxu0 %v2630_v39  ;;  %v2695_v20 = vld [vmem:[#allocation6 + $0x4f0] sm:$0xf0]  ;;  %v94_v24 = vld [vmem:[#allocation3 + $0x58] sm:$0xff]  ;;  %v3031_v25 = vld [vmem:[#allocation6 + $0x104] sm:$0xf]  ;;  %v2710_v26 = vor.u32 %v3161_v12, %v2709_v9  ;;  %v2570_v32 = vor.u32 %v3123_v17, %v2567_v18 }
  0x4a   :  { %1368 = vmatpush.bf16.msrb.mxu1 %v2758_v42  ;;  %2851 = vmatmul.msk.bf16.vlgmr.msrb.gmra.mxu2 %vm1290_vm0, %v3444_v50  ;;  %v87_v23 = vld [vmem:[#allocation3 + $0x20] sm:$0xff]  ;;  %v88_v29 = vld [vmem:[#allocation3 + $0x28] sm:$0xff]  ;;  %v3187_v33 = vld [vmem:[#allocation6 + $0x5e4] sm:$0xf]  ;;  %v2698_v36 = vor.u32 %v3155_v19, %v2695_v20 }
  0x4b   :  { %1396 = vmatpush.bf16.msrb.mxu3 %v2122_v43  ;;  %v2199_v28 = vld [vmem:[#allocation6 + $0x110] sm:$0xf0]  ;;  %v3087_v35 = vld [vmem:[#allocation6 + $0x2c4] sm:$0xf]  ;;  %v3448_v37 = vpack.c.bf16 %v94_v24, %v87_v23 }
  0x4c   :  { %1409 = vmatpush.bf16.msra.mxu2 %v2266_v38  ;;  %v95_v30 = vld [vmem:[#allocation3 + $0x60] sm:$0xff]  ;;  %v3119_v39 = vld [vmem:[#allocation6 + $0x3c4] sm:$0xf]  ;;  %v2202_v41 = vor.u32 %v3031_v25, %v2199_v28 }
  0x4d   :  { %1355 = vmatpush.bf16.msrb.mxu0 %v2614_v52  ;;  %v2823_v34 = vld [vmem:[#allocation6 + $0x5f0] sm:$0xf0]  ;;  %v3450_v42 = vpack.c.bf16 %v95_v30, %v88_v29  ;;  %v3151_v43 = vld [vmem:[#allocation6 + $0x4c4] sm:$0xf] }
  0x4e   :  { %1369 = vmatpush.bf16.msrb.mxu1 %v2742_v57  ;;  %v2423_v38 = vld [vmem:[#allocation6 + $0x2d0] sm:$0xf0]  ;;  %v2826_v45 = vor.u32 %v3187_v33, %v2823_v34  ;;  %v3183_v48 = vld [vmem:[#allocation6 + $0x5c4] sm:$0xf] }
  0x4f   :  { %1397 = vmatpush.bf16.msrb.mxu3 %v2106_v58  ;;  %v2551_v40 = vld [vmem:[#allocation6 + $0x3d0] sm:$0xf0]  ;;  %v2426_v46 = vor.u32 %v3087_v35, %v2423_v38  ;;  %v3115_v56 = vld [vmem:[#allocation6 + $0x3a4] sm:$0xf] }
  0x50   :  { %1410 = vmatpush.bf16.msra.mxu2 %v2250_v51  ;;  %v2679_v44 = vld [vmem:[#allocation6 + $0x4d0] sm:$0xf0]  ;;  %v2554_v47 = vor.u32 %v3119_v39, %v2551_v40  ;;  %v3083_v51 = vld [vmem:[#allocation6 + $0x2a4] sm:$0xf] }
  0x51   :  { %1356 = vmatpush.bf16.msrb.mxu0 %v2598_v5  ;;  %v2807_v49 = vld [vmem:[#allocation6 + $0x5d0] sm:$0xf0]  ;;  %v2682_v52 = vor.u32 %v3151_v43, %v2679_v44  ;;  %v3147_v58 = vld [vmem:[#allocation6 + $0x4a4] sm:$0xf] }
  0x52   :  { %1370 = vmatpush.bf16.msrb.mxu1 %v2726_v10  ;;  %v2407_v53 = vld [vmem:[#allocation6 + $0x2b0] sm:$0xf0]  ;;  %v2810_v61 = vor.u32 %v3183_v48, %v2807_v49  ;;  %v3179_v0 = vld [vmem:[#allocation6 + $0x5a4] sm:$0xf] }
  0x53   :  { %1398 = vmatpush.bf16.msrb.mxu3 %v2090_v11  ;;  %v2535_v57 = vld [vmem:[#allocation6 + $0x3b0] sm:$0xf0]  ;;  %v2410_v62 = vor.u32 %v3083_v51, %v2407_v53  ;;  %v3079_v2 = vld [vmem:[#allocation6 + $0x284] sm:$0xf] }
  0x54   :  { %1411 = vmatpush.bf16.msra.mxu2 %v2234_v4  ;;  %v2663_v59 = vld [vmem:[#allocation6 + $0x4b0] sm:$0xf0]  ;;  %v2538_v63 = vor.u32 %v3115_v56, %v2535_v57  ;;  %v3111_v5 = vld [vmem:[#allocation6 + $0x384] sm:$0xf] }
  0x55   :  { %1357 = vmatpush.bf16.msrb.mxu0 %v2582_v22  ;;  %v2791_v1 = vld [vmem:[#allocation6 + $0x5b0] sm:$0xf0]  ;;  %v2666_v3 = vor.u32 %v3147_v58, %v2663_v59  ;;  %v3143_v7 = vld [vmem:[#allocation6 + $0x484] sm:$0xf] }
  0x56   :  { %1371 = vmatpush.bf16.msrb.mxu1 %v2710_v26  ;;  %v2391_v4 = vld [vmem:[#allocation6 + $0x290] sm:$0xf0]  ;;  %v2794_v10 = vor.u32 %v3179_v0, %v2791_v1  ;;  %v3175_v13 = vld [vmem:[#allocation6 + $0x584] sm:$0xf]  ;;  %v2189_v0 = vld [vmem:[#allocation6 + $0xe8] sm:$0xf] }
  0x57   :  { %1399 = vmatpush.bf16.msrb.mxu3 %v2074_v27  ;;  %v2519_v6 = vld [vmem:[#allocation6 + $0x390] sm:$0xf0]  ;;  %v2394_v11 = vor.u32 %v3079_v2, %v2391_v4  ;;  %v3075_v15 = vld [vmem:[#allocation6 + $0x264] sm:$0xf]  ;;  %v3030_v1 = vld [vmem:[#allocation6 + $0xf4] sm:$0xf0] }
  0x58   :  { %1412 = vmatpush.bf16.msra.mxu2 %v2218_v21  ;;  %1358 = vmatmul.bf16.vlgmr.msrb.gmra.mxu0 %v3448_v37  ;;  %v2647_v9 = vld [vmem:[#allocation6 + $0x490] sm:$0xf0]  ;;  %v2522_v12 = vor.u32 %v3111_v5, %v2519_v6  ;;  %v3107_v18 = vld [vmem:[#allocation6 + $0x364] sm:$0xf]  ;;  %v2445_v5 = vld [vmem:[#allocation6 + $0x2e8] sm:$0xf] }
  0x59   :  { %1420 = vmatpush.bf16.msra.mxu0 %v2442_v31  ;;  %1372 = vmatmul.bf16.vlgmr.msrb.gmra.mxu1 %v3450_v42  ;;  %v2775_v14 = vld [vmem:[#allocation6 + $0x590] sm:$0xf0]  ;;  %v2650_v16 = vor.u32 %v3143_v7, %v2647_v9  ;;  %v3139_v20 = vld [vmem:[#allocation6 + $0x464] sm:$0xf]  ;;  %v3094_v6 = vld [vmem:[#allocation6 + $0x2f4] sm:$0xf0] }
  0x5a   :  { %1434 = vmatpush.bf16.msra.mxu1 %v2570_v32  ;;  %1400 = vmatmul.bf16.vlgmr.msrb.gmra.mxu3 %v3434_v55  ;;  %v2375_v17 = vld [vmem:[#allocation6 + $0x270] sm:$0xf0]  ;;  %v2778_v22 = vor.u32 %v3175_v13, %v2775_v14  ;;  %v3171_v25 = vld [vmem:[#allocation6 + $0x564] sm:$0xf]  ;;  %v2190_v13 = vor.u32 %v3030_v1, %v2189_v0  ;;  %v2573_v14 = vld [vmem:[#allocation6 + $0x3e8] sm:$0xf] }
  0x5b   :  { %1448 = vmatpush.bf16.msra.mxu3 %v2698_v36  ;;  %v2503_v19 = vld [vmem:[#allocation6 + $0x370] sm:$0xf0]  ;;  %v2378_v23 = vor.u32 %v3075_v15, %v2375_v17  ;;  %v3071_v27 = vld [vmem:[#allocation6 + $0x244] sm:$0xf]  ;;  %v3126_v15 = vld [vmem:[#allocation6 + $0x3f4] sm:$0xf0] }
  0x5c   :  { %1413 = vmatpush.bf16.msra.mxu2 %v2202_v41  ;;  %v2631_v21 = vld [vmem:[#allocation6 + $0x470] sm:$0xf0]  ;;  %v2506_v24 = vor.u32 %v3107_v18, %v2503_v19  ;;  %v3103_v30 = vld [vmem:[#allocation6 + $0x344] sm:$0xf]  ;;  %v2317_v17 = vld [vmem:[#allocation6 + $0x1e8] sm:$0xf]  ;;  %v2446_v19 = vor.u32 %v3094_v6, %v2445_v5 }
  0x5d   :  { %1421 = vmatpush.bf16.msra.mxu0 %v2426_v46  ;;  %v2759_v26 = vld [vmem:[#allocation6 + $0x570] sm:$0xf0]  ;;  %v2634_v28 = vor.u32 %v3139_v20, %v2631_v21  ;;  %v3135_v32 = vld [vmem:[#allocation6 + $0x444] sm:$0xf]  ;;  %v3062_v18 = vld [vmem:[#allocation6 + $0x1f4] sm:$0xf0] }
  0x5e   :  { %1435 = vmatpush.bf16.msra.mxu1 %v2554_v47  ;;  %v2359_v29 = vld [vmem:[#allocation6 + $0x250] sm:$0xf0]  ;;  %v2762_v34 = vor.u32 %v3171_v25, %v2759_v26  ;;  %v3167_v38 = vld [vmem:[#allocation6 + $0x544] sm:$0xf]  ;;  %v2173_v21 = vld [vmem:[#allocation6 + $0xc8] sm:$0xf]  ;;  %v2318_v26 = vor.u32 %v3062_v18, %v2317_v17 }
  0x5f   :  { %1449 = vmatpush.bf16.msra.mxu3 %v2682_v52  ;;  %1414 = vmatmul.bf16.vlgmr.msra.gmra.mxu2 %v3440_v8  ;;  %v2487_v31 = vld [vmem:[#allocation6 + $0x350] sm:$0xf0]  ;;  %v2362_v35 = vor.u32 %v3071_v27, %v2359_v29  ;;  %v3067_v40 = vld [vmem:[#allocation6 + $0x224] sm:$0xf]  ;;  %v3090_v25 = vld [vmem:[#allocation6 + $0x2d4] sm:$0xf0] }
  0x60   :  { %1462 = vmatpush.bf16.msrb.mxu2 %v2826_v45  ;;  %v2615_v33 = vld [vmem:[#allocation6 + $0x450] sm:$0xf0]  ;;  %v2490_v36 = vor.u32 %v3103_v30, %v2487_v31  ;;  %v3099_v44 = vld [vmem:[#allocation6 + $0x324] sm:$0xf]  ;;  %v2557_v27 = vld [vmem:[#allocation6 + $0x3c8] sm:$0xf] }
  0x61   :  { %1422 = vmatpush.bf16.msra.mxu0 %v2410_v62  ;;  %v2743_v39 = vld [vmem:[#allocation6 + $0x550] sm:$0xf0]  ;;  %v2618_v41 = vor.u32 %v3135_v32, %v2615_v33  ;;  %v3131_v46 = vld [vmem:[#allocation6 + $0x424] sm:$0xf]  ;;  %v2301_v30 = vld [vmem:[#allocation6 + $0x1c8] sm:$0xf] }
  0x62   :  { %1436 = vmatpush.bf16.msra.mxu1 %v2538_v63  ;;  %v2343_v43 = vld [vmem:[#allocation6 + $0x230] sm:$0xf0]  ;;  %v2746_v48 = vor.u32 %v3167_v38, %v2743_v39  ;;  %v3163_v49 = vld [vmem:[#allocation6 + $0x524] sm:$0xf]  ;;  %v3058_v31 = vld [vmem:[#allocation6 + $0x1d4] sm:$0xf0] }
  0x63   :  { %1450 = vmatpush.bf16.msra.mxu3 %v2666_v3  ;;  %v2471_v45 = vld [vmem:[#allocation6 + $0x330] sm:$0xf0]  ;;  %v2346_v52 = vor.u32 %v3067_v40, %v2343_v43  ;;  %v3063_v56 = vld [vmem:[#allocation6 + $0x204] sm:$0xf]  ;;  %v2157_v33 = vld [vmem:[#allocation6 + $0xa8] sm:$0xf]  ;;  %v2302_v39 = vor.u32 %v3058_v31, %v2301_v30 }
  0x64   :  { %1463 = vmatpush.bf16.msrb.mxu2 %v2810_v61  ;;  %v2599_v47 = vld [vmem:[#allocation6 + $0x430] sm:$0xf0]  ;;  %v2474_v53 = vor.u32 %v3099_v44, %v2471_v45  ;;  %v3095_v58 = vld [vmem:[#allocation6 + $0x304] sm:$0xf]  ;;  %v3086_v38 = vld [vmem:[#allocation6 + $0x2b4] sm:$0xf0] }
  0x65   :  { %1423 = vmatpush.bf16.msra.mxu0 %v2394_v11  ;;  %v2727_v51 = vld [vmem:[#allocation6 + $0x530] sm:$0xf0]  ;;  %v2602_v59 = vor.u32 %v3131_v46, %v2599_v47  ;;  %v3127_v62 = vld [vmem:[#allocation6 + $0x404] sm:$0xf]  ;;  %v2541_v40 = vld [vmem:[#allocation6 + $0x3a8] sm:$0xf] }
  0x66   :  { %1437 = vmatpush.bf16.msra.mxu1 %v2522_v12  ;;  %v2327_v57 = vld [vmem:[#allocation6 + $0x210] sm:$0xf0]  ;;  %v3191_v2 = vld [vmem:[#allocation6 + $0x604] sm:$0xf]  ;;  %v2730_v3 = vor.u32 %v3163_v49, %v2727_v51  ;;  %v2285_v44 = vld [vmem:[#allocation6 + $0x1a8] sm:$0xf] }
  0x67   :  { %1451 = vmatpush.bf16.msra.mxu3 %v2650_v16  ;;  %v2455_v61 = vld [vmem:[#allocation6 + $0x310] sm:$0xf0]  ;;  %v2330_v7 = vor.u32 %v3063_v56, %v2327_v57  ;;  %v3054_v45 = vld [vmem:[#allocation6 + $0x1b4] sm:$0xf0]  ;;  %v2141_v47 = vld [vmem:[#allocation6 + $0x88] sm:$0xf] }
  0x68   :  { %1464 = vmatpush.bf16.msrb.mxu2 %v2794_v10  ;;  %v2583_v63 = vld [vmem:[#allocation6 + $0x410] sm:$0xf0]  ;;  %v2458_v9 = vor.u32 %v3095_v58, %v2455_v61  ;;  %v3159_v10 = vld [vmem:[#allocation6 + $0x504] sm:$0xf]  ;;  %v2397_v51 = vld [vmem:[#allocation6 + $0x288] sm:$0xf] }
  0x69   :  { %1424 = vmatpush.bf16.msra.mxu0 %v2378_v23  ;;  %v2839_v4 = vld [vmem:[#allocation6 + $0x610] sm:$0xf0]  ;;  %v2586_v12 = vor.u32 %v3127_v62, %v2583_v63  ;;  %v2574_v23 = vor.u32 %v3126_v15, %v2573_v14  ;;  %v2525_v56 = vld [vmem:[#allocation6 + $0x388] sm:$0xf]  ;;  %v3114_v57 = vld [vmem:[#allocation6 + $0x394] sm:$0xf0] }
  0x6a   :  { %1438 = vmatpush.bf16.msra.mxu1 %v2506_v24  ;;  %v2711_v11 = vld [vmem:[#allocation6 + $0x510] sm:$0xf0]  ;;  %v2842_v16 = vor.u32 %v3191_v2, %v2839_v4  ;;  %v2429_v24 = vld [vmem:[#allocation6 + $0x2c8] sm:$0xf]  ;;  %v3050_v61 = vld [vmem:[#allocation6 + $0x194] sm:$0xf0]  ;;  %v2526_v1 = vor.u32 %v3114_v57, %v2525_v56 }
  0x6b   :  { %1452 = vmatpush.bf16.msra.mxu3 %v2634_v28  ;;  %v2714_v20 = vor.u32 %v3159_v10, %v2711_v11  ;;  %v3122_v28 = vld [vmem:[#allocation6 + $0x3d4] sm:$0xf0]  ;;  %v2430_v32 = vor.u32 %v3090_v25, %v2429_v24  ;;  %v2125_v63 = vld [vmem:[#allocation6 + $0x68] sm:$0xf]  ;;  %v3028_v56 = vld [vmem:[#allocation6 + $0xec] sm:$0xf] }
  0x6c   :  { %1465 = vmatpush.bf16.msrb.mxu2 %v2778_v22  ;;  %v3026_v22 = vld [vmem:[#allocation6 + $0xd4] sm:$0xf0]  ;;  %v2381_v2 = vld [vmem:[#allocation6 + $0x268] sm:$0xf]  ;;  %v2191_v57 = vld [vmem:[#allocation6 + $0xf8] sm:$0xf0] }
  0x6d   :  { %1425 = vmatpush.bf16.msra.mxu0 %v2362_v35  ;;  %v2174_v29 = vor.u32 %v3026_v22, %v2173_v21  ;;  %v2558_v35 = vor.u32 %v3122_v28, %v2557_v27  ;;  %v3014_v0 = vld [vmem:[#allocation6 + $0x74] sm:$0xf0]  ;;  %v2509_v5 = vld [vmem:[#allocation6 + $0x368] sm:$0xf] }
  0x6e   :  { %1439 = vmatpush.bf16.msra.mxu1 %v2490_v36  ;;  %v2413_v36 = vld [vmem:[#allocation6 + $0x2a8] sm:$0xf]  ;;  %v3110_v6 = vld [vmem:[#allocation6 + $0x374] sm:$0xf0] }
  0x6f   :  { %1453 = vmatpush.bf16.msra.mxu3 %v2618_v41  ;;  %v3118_v41 = vld [vmem:[#allocation6 + $0x3b4] sm:$0xf0]  ;;  %v2414_v46 = vor.u32 %v3086_v38, %v2413_v36  ;;  %v2510_v14 = vor.u32 %v3110_v6, %v2509_v5  ;;  %v2365_v15 = vld [vmem:[#allocation6 + $0x248] sm:$0xf]  ;;  %v2194_v6 = vor.u32 %v3028_v56, %v2191_v57 }
  0x70   :  { %1466 = vmatpush.bf16.msrb.mxu2 %v2762_v34  ;;  %v3022_v34 = vld [vmem:[#allocation6 + $0xb4] sm:$0xf0]  ;;  %v2542_v49 = vor.u32 %v3118_v41, %v2541_v40  ;;  %v2493_v18 = vld [vmem:[#allocation6 + $0x348] sm:$0xf] }
  0x71   :  { %1426 = vmatpush.bf16.msra.mxu0 %v2346_v52  ;;  %v2158_v43 = vor.u32 %v3022_v34, %v2157_v33  ;;  %v3082_v52 = vld [vmem:[#allocation6 + $0x294] sm:$0xf0]  ;;  %v2237_v21 = vld [vmem:[#allocation6 + $0x148] sm:$0xf] }
  0x72   :  { %1440 = vmatpush.bf16.msra.mxu1 %v2474_v53  ;;  %v2286_v53 = vor.u32 %v3054_v45, %v2285_v44  ;;  %v2398_v62 = vor.u32 %v3082_v52, %v2397_v51  ;;  %v3046_v10 = vld [vmem:[#allocation6 + $0x174] sm:$0xf0]  ;;  %v2093_v24 = vld [vmem:[#allocation6 + $0x28] sm:$0xf] }
  0x73   :  { %1454 = vmatpush.bf16.msra.mxu3 %v2602_v59  ;;  %v2269_v59 = vld [vmem:[#allocation6 + $0x188] sm:$0xf]  ;;  %v3042_v22 = vld [vmem:[#allocation6 + $0x154] sm:$0xf0] }
  0x74   :  { %1467 = vmatpush.bf16.msrb.mxu2 %v2746_v48  ;;  %v3018_v48 = vld [vmem:[#allocation6 + $0x94] sm:$0xf0]  ;;  %v2270_v4 = vor.u32 %v3050_v61, %v2269_v59  ;;  %v2349_v27 = vld [vmem:[#allocation6 + $0x228] sm:$0xf] }
  0x75   :  { %1427 = vmatpush.bf16.msra.mxu0 %v2330_v7  ;;  %v2142_v58 = vor.u32 %v3018_v48, %v2141_v47  ;;  %v2126_v7 = vor.u32 %v3014_v0, %v2125_v63  ;;  %v3006_v25 = vld [vmem:[#allocation6 + $0x34] sm:$0xf0]  ;;  %v2477_v30 = vld [vmem:[#allocation6 + $0x328] sm:$0xf] }
  0x76   :  { %1441 = vmatpush.bf16.msra.mxu1 %v2458_v9  ;;  %v2253_v9 = vld [vmem:[#allocation6 + $0x168] sm:$0xf]  ;;  %v3070_v28 = vld [vmem:[#allocation6 + $0x234] sm:$0xf0] }
  0x77   :  { %1455 = vmatpush.bf16.msra.mxu3 %v2586_v12  ;;  %v2109_v12 = vld [vmem:[#allocation6 + $0x48] sm:$0xf]  ;;  %v2254_v17 = vor.u32 %v3046_v10, %v2253_v9  ;;  %v3102_v31 = vld [vmem:[#allocation6 + $0x334] sm:$0xf0]  ;;  %v2350_v36 = vor.u32 %v3070_v28, %v2349_v27  ;;  %v3024_v9 = vld [vmem:[#allocation6 + $0xcc] sm:$0xf] }
  0x78   :  { %1468 = vmatpush.bf16.msrb.mxu2 %v2730_v3  ;;  %1428 = vmatmul.bf16.vlgmr.msra.gmra.mxu0 %v3432_v54  ;;  %v3078_v3 = vld [vmem:[#allocation6 + $0x274] sm:$0xf0]  ;;  %v2221_v33 = vld [vmem:[#allocation6 + $0x128] sm:$0xf]  ;;  %v2478_v41 = vor.u32 %v3102_v31, %v2477_v30  ;;  %v2175_v10 = vld [vmem:[#allocation6 + $0xd8] sm:$0xf0] }
  0x79   :  { %1518 = vmatpush.bf16.msrb.mxu0 %v2446_v19  ;;  %1442 = vmatmul.bf16.vlgmr.msra.gmra.mxu1 %v3436_v60  ;;  %v2382_v11 = vor.u32 %v3078_v3, %v2381_v2  ;;  %v3106_v19 = vld [vmem:[#allocation6 + $0x354] sm:$0xf0]  ;;  %v2333_v44 = vld [vmem:[#allocation6 + $0x208] sm:$0xf]  ;;  %v3060_v3 = vld [vmem:[#allocation6 + $0x1ec] sm:$0xf] }
  0x7a   :  { %1490 = vmatpush.bf16.msrb.mxu1 %v2190_v13  ;;  %1456 = vmatmul.bf16.vlgmr.msra.gmra.mxu3 %v3448_v37  ;;  %v3010_v13 = vld [vmem:[#allocation6 + $0x54] sm:$0xf0]  ;;  %v2829_v61 = vld [vmem:[#allocation6 + $0x5e8] sm:$0xf]  ;;  %v2287_v30 = vld [vmem:[#allocation6 + $0x1b8] sm:$0xf0] }
  0x7b   :  { %1483 = vmatpush.bf16.msrb.mxu3 %v2842_v16  ;;  %v3074_v16 = vld [vmem:[#allocation6 + $0x254] sm:$0xf0]  ;;  %v2685_v63 = vld [vmem:[#allocation6 + $0x4c8] sm:$0xf] }
  0x7c   :  { %1469 = vmatpush.bf16.msrb.mxu2 %v2714_v20  ;;  %v2110_v20 = vor.u32 %v3010_v13, %v2109_v12  ;;  %v3038_v34 = vld [vmem:[#allocation6 + $0x134] sm:$0xf0]  ;;  %v2813_v13 = vld [vmem:[#allocation6 + $0x5c8] sm:$0xf] }
  0x7d   :  { %1519 = vmatpush.bf16.msrb.mxu0 %v2430_v32  ;;  %v2094_v32 = vor.u32 %v3006_v25, %v2093_v24  ;;  %v3002_v38 = vld [vmem:[#allocation6 + $0x14] sm:$0xf0]  ;;  %v2222_v47 = vor.u32 %v3038_v34, %v2221_v33  ;;  %v2797_v25 = vld [vmem:[#allocation6 + $0x5a8] sm:$0xf]  ;;  %v3016_v33 = vld [vmem:[#allocation6 + $0x8c] sm:$0xf] }
  0x7e   :  { %1491 = vmatpush.bf16.msrb.mxu1 %v2174_v29  ;;  %v2238_v29 = vor.u32 %v3042_v22, %v2237_v21  ;;  %v3158_v40 = vld [vmem:[#allocation6 + $0x4f4] sm:$0xf0]  ;;  %v3020_v21 = vld [vmem:[#allocation6 + $0xac] sm:$0xf]  ;;  %v2159_v22 = vld [vmem:[#allocation6 + $0xb8] sm:$0xf0] }
  0x7f   :  { %1504 = vmatpush.bf16.msra.mxu3 %v2318_v26  ;;  %1470 = vmatmul.bf16.vlgmr.msrb.gmra.mxu2 %v3450_v42  ;;  %v2494_v26 = vor.u32 %v3106_v19, %v2493_v18  ;;  %v3066_v45 = vld [vmem:[#allocation6 + $0x214] sm:$0xf0]  ;;  %v2303_v18 = vld [vmem:[#allocation6 + $0x1d8] sm:$0xf0]  ;;  %v2178_v19 = vor.u32 %v3024_v9, %v2175_v10  ;;  %v2653_v27 = vld [vmem:[#allocation6 + $0x488] sm:$0xf]  ;;  %v2162_v31 = vor.u32 %v3020_v21, %v2159_v22 }
  0x80   :  { %1532 = vmatpush.bf16.msra.mxu2 %v2574_v23  ;;  %v2366_v23 = vor.u32 %v3074_v16, %v2365_v15  ;;  %v3098_v48 = vld [vmem:[#allocation6 + $0x314] sm:$0xf0]  ;;  %v2334_v59 = vor.u32 %v3066_v45, %v2333_v44  ;;  %v2669_v15 = vld [vmem:[#allocation6 + $0x4a8] sm:$0xf]  ;;  %v2143_v34 = vld [vmem:[#allocation6 + $0x98] sm:$0xf0] }
  0x81   :  { %1520 = vmatpush.bf16.msrb.mxu0 %v2414_v46  ;;  %v2461_v46 = vld [vmem:[#allocation6 + $0x308] sm:$0xf]  ;;  %v3194_v51 = vld [vmem:[#allocation6 + $0x614] sm:$0xf0]  ;;  %v2271_v44 = vld [vmem:[#allocation6 + $0x198] sm:$0xf0]  ;;  %v2146_v45 = vor.u32 %v3016_v33, %v2143_v34 }
  0x82   :  { %1492 = vmatpush.bf16.msrb.mxu1 %v2158_v43  ;;  %v2205_v43 = vld [vmem:[#allocation6 + $0x108] sm:$0xf]  ;;  %v2462_v0 = vor.u32 %v3098_v48, %v2461_v46  ;;  %v3150_v16 = vld [vmem:[#allocation6 + $0x4b4] sm:$0xf0]  ;;  %v2127_v48 = vld [vmem:[#allocation6 + $0x78] sm:$0xf0] }
  0x83   :  { %1505 = vmatpush.bf16.msra.mxu3 %v2302_v39  ;;  %v2701_v39 = vld [vmem:[#allocation6 + $0x4e8] sm:$0xf]  ;;  %v3146_v28 = vld [vmem:[#allocation6 + $0x494] sm:$0xf0]  ;;  %v2239_v9 = vld [vmem:[#allocation6 + $0x158] sm:$0xf0] }
  0x84   :  { %1533 = vmatpush.bf16.msra.mxu2 %v2558_v35  ;;  %v2077_v35 = vld [vmem:[#allocation6 + $0x8] sm:$0xf]  ;;  %v3138_v57 = vld [vmem:[#allocation6 + $0x454] sm:$0xf0]  ;;  %v2223_v21 = vld [vmem:[#allocation6 + $0x138] sm:$0xf0] }
  0x85   :  { %1521 = vmatpush.bf16.msrb.mxu0 %v2398_v62  ;;  %v2078_v52 = vor.u32 %v3002_v38, %v2077_v35  ;;  %v3190_v62 = vld [vmem:[#allocation6 + $0x5f4] sm:$0xf0]  ;;  %v2654_v35 = vor.u32 %v3146_v28, %v2653_v27  ;;  %v2781_v38 = vld [vmem:[#allocation6 + $0x588] sm:$0xf]  ;;  %v3000_v27 = vld [vmem:[#allocation6 + $0xc] sm:$0xf] }
  0x86   :  { %1493 = vmatpush.bf16.msrb.mxu1 %v2142_v58  ;;  %v2702_v58 = vor.u32 %v3158_v40, %v2701_v39  ;;  %v3178_v39 = vld [vmem:[#allocation6 + $0x594] sm:$0xf0]  ;;  %v2637_v40 = vld [vmem:[#allocation6 + $0x468] sm:$0xf]  ;;  %v2079_v28 = vld [vmem:[#allocation6 + $0x18] sm:$0xf0] }
  0x87   :  { %1506 = vmatpush.bf16.msra.mxu3 %v2286_v53  ;;  %v3034_v53 = vld [vmem:[#allocation6 + $0x114] sm:$0xf0]  ;;  %v2782_v46 = vor.u32 %v3178_v39, %v2781_v38  ;;  %v2621_v56 = vld [vmem:[#allocation6 + $0x448] sm:$0xf]  ;;  %v2575_v33 = vld [vmem:[#allocation6 + $0x3f8] sm:$0xf0]  ;;  %v2082_v39 = vor.u32 %v3000_v27, %v2079_v28 }
  0x88   :  { %1534 = vmatpush.bf16.msra.mxu2 %v2542_v49  ;;  %v2845_v49 = vld [vmem:[#allocation6 + $0x608] sm:$0xf]  ;;  %v2206_v5 = vor.u32 %v3034_v53, %v2205_v43  ;;  %v3048_v43 = vld [vmem:[#allocation6 + $0x18c] sm:$0xf]  ;;  %v3174_v53 = vld [vmem:[#allocation6 + $0x574] sm:$0xf0] }
  0x89   :  { %1522 = vmatpush.bf16.msrb.mxu0 %v2382_v11  ;;  %v2846_v2 = vor.u32 %v3194_v51, %v2845_v49  ;;  %v2274_v51 = vor.u32 %v3048_v43, %v2271_v44  ;;  %v3088_v38 = vld [vmem:[#allocation6 + $0x2cc] sm:$0xf]  ;;  %v2207_v43 = vld [vmem:[#allocation6 + $0x118] sm:$0xf0] }
  0x8a   :  { %1494 = vmatpush.bf16.msrb.mxu1 %v2126_v7  ;;  %2852 = vmatmul.msk.bf16.vlgmr.msrb.gmra.mxu3 %vm1290_vm0, %v3444_v50  ;;  %v2830_v7 = vor.u32 %v3190_v62, %v2829_v61  ;;  %v2511_v28 = vld [vmem:[#allocation6 + $0x378] sm:$0xf0] }
  0x8b   :  { %1507 = vmatpush.bf16.msra.mxu3 %v2270_v4  ;;  %v2319_v4 = vld [vmem:[#allocation6 + $0x1f8] sm:$0xf0] }
  0x8c   :  { %1535 = vmatpush.bf16.msra.mxu2 %v2526_v1  ;;  %v3154_v1 = vld [vmem:[#allocation6 + $0x4d4] sm:$0xf0]  ;;  %v2322_v12 = vor.u32 %v3060_v3, %v2319_v4  ;;  %v2749_v3 = vld [vmem:[#allocation6 + $0x548] sm:$0xf] }
  0x8d   :  { %1523 = vmatpush.bf16.msrb.mxu0 %v2366_v23  ;;  %v2686_v11 = vor.u32 %v3154_v1, %v2685_v63  ;;  %v2670_v23 = vor.u32 %v3150_v16, %v2669_v15  ;;  %v3008_v63 = vld [vmem:[#allocation6 + $0x4c] sm:$0xf]  ;;  %v2622_v1 = vor.u32 %v3138_v57, %v2621_v56  ;;  %v3170_v4 = vld [vmem:[#allocation6 + $0x554] sm:$0xf0]  ;;  %v2733_v16 = vld [vmem:[#allocation6 + $0x528] sm:$0xf] }
  0x8e   :  { %1495 = vmatpush.bf16.msrb.mxu1 %v2110_v20  ;;  %v3152_v56 = vld [vmem:[#allocation6 + $0x4cc] sm:$0xf]  ;;  %v2687_v57 = vld [vmem:[#allocation6 + $0x4d8] sm:$0xf0] }
  0x8f   :  { %1508 = vmatpush.bf16.msra.mxu3 %v2254_v17  ;;  %v3056_v17 = vld [vmem:[#allocation6 + $0x1cc] sm:$0xf] }
  0x90   :  { %1536 = vmatpush.bf16.msra.mxu2 %v2510_v14  ;;  %v3186_v14 = vld [vmem:[#allocation6 + $0x5d4] sm:$0xf0]  ;;  %v2306_v24 = vor.u32 %v3056_v17, %v2303_v18  ;;  %v2589_v18 = vld [vmem:[#allocation6 + $0x408] sm:$0xf] }
  0x91   :  { %1524 = vmatpush.bf16.msrb.mxu0 %v2350_v36  ;;  %v2814_v20 = vor.u32 %v3186_v14, %v2813_v13  ;;  %v2095_v13 = vld [vmem:[#allocation6 + $0x38] sm:$0xf0]  ;;  %v3166_v17 = vld [vmem:[#allocation6 + $0x534] sm:$0xf0] }
  0x92   :  { %1496 = vmatpush.bf16.msrb.mxu1 %v2094_v32 }
  0x93   :  { %1509 = vmatpush.bf16.msra.mxu3 %v2238_v29  ;;  %v3052_v29 = vld [vmem:[#allocation6 + $0x1ac] sm:$0xf] }
  0x94   :  { %1537 = vmatpush.bf16.msra.mxu2 %v2494_v26  ;;  %v3182_v26 = vld [vmem:[#allocation6 + $0x5b4] sm:$0xf0]  ;;  %v2290_v36 = vor.u32 %v3052_v29, %v2287_v30 }
  0x95   :  { %1525 = vmatpush.bf16.msrb.mxu0 %v2334_v59  ;;  %v2798_v32 = vor.u32 %v3182_v26, %v2797_v25  ;;  %v2255_v59 = vld [vmem:[#allocation6 + $0x178] sm:$0xf0]  ;;  %v2734_v25 = vor.u32 %v3166_v17, %v2733_v16  ;;  %v2717_v26 = vld [vmem:[#allocation6 + $0x508] sm:$0xf] }
  0x96   :  { %1497 = vmatpush.bf16.msrb.mxu1 %v2078_v52  ;;  %v2765_v52 = vld [vmem:[#allocation6 + $0x568] sm:$0xf]  ;;  %v2527_v17 = vld [vmem:[#allocation6 + $0x398] sm:$0xf0] }
  0x97   :  { %1510 = vmatpush.bf16.msra.mxu3 %v2222_v47  ;;  %v3012_v47 = vld [vmem:[#allocation6 + $0x6c] sm:$0xf]  ;;  %v2766_v62 = vor.u32 %v3174_v53, %v2765_v52  ;;  %v2559_v53 = vld [vmem:[#allocation6 + $0x3d8] sm:$0xf0] }
  0x98   :  { %1538 = vmatpush.bf16.msra.mxu2 %v2478_v41  ;;  %1526 = vmatmul.bf16.vlgmr.msrb.gmra.mxu0 %v3432_v54  ;;  %v3142_v41 = vld [vmem:[#allocation6 + $0x474] sm:$0xf0]  ;;  %v2130_v61 = vor.u32 %v3012_v47, %v2127_v48 }
  0x99   :  { %1581 = vmatpush.bf16.msra.mxu0 %v2846_v2  ;;  %1498 = vmatmul.bf16.vlgmr.msrb.gmra.mxu1 %v3434_v55  ;;  %v2638_v49 = vor.u32 %v3142_v41, %v2637_v40  ;;  %v2431_v40 = vld [vmem:[#allocation6 + $0x2d8] sm:$0xf0]  ;;  %v3032_v41 = vld [vmem:[#allocation6 + $0x10c] sm:$0xf] }
  0x9a   :  { %1546 = vmatpush.bf16.msra.mxu1 %v2702_v58  ;;  %v3044_v58 = vld [vmem:[#allocation6 + $0x16c] sm:$0xf]  ;;  %v2210_v52 = vor.u32 %v3032_v41, %v2207_v43  ;;  %v2623_v43 = vld [vmem:[#allocation6 + $0x458] sm:$0xf0] }
  0x9b   :  { %1511 = vmatpush.bf16.msra.mxu3 %v2206_v5  ;;  %v2258_v2 = vor.u32 %v3044_v58, %v2255_v59  ;;  %v2605_v5 = vld [vmem:[#allocation6 + $0x428] sm:$0xf]  ;;  %v3084_v59 = vld [vmem:[#allocation6 + $0x2ac] sm:$0xf] }
  0x9c   :  { %1539 = vmatpush.bf16.msra.mxu2 %v2462_v0  ;;  %v2111_v0 = vld [vmem:[#allocation6 + $0x58] sm:$0xf0]  ;;  %v3136_v41 = vld [vmem:[#allocation6 + $0x44c] sm:$0xf] }
  0x9d   :  { %1602 = vmatpush.bf16.msrb.mxu0 %v2322_v12  ;;  %v2114_v10 = vor.u32 %v3008_v63, %v2111_v0  ;;  %v3004_v12 = vld [vmem:[#allocation6 + $0x2c] sm:$0xf]  ;;  %v2815_v63 = vld [vmem:[#allocation6 + $0x5d8] sm:$0xf0] }
  0x9e   :  { %1547 = vmatpush.bf16.msra.mxu1 %v2686_v11  ;;  %1512 = vmatmul.bf16.vlgmr.msra.gmra.mxu3 %v3440_v8  ;;  %v2750_v11 = vor.u32 %v3170_v4, %v2749_v3  ;;  %v2098_v22 = vor.u32 %v3004_v12, %v2095_v13  ;;  %v2543_v4 = vld [vmem:[#allocation6 + $0x3b8] sm:$0xf0] }
  0x9f   :  { %1560 = vmatpush.bf16.msrb.mxu3 %v2830_v7  ;;  %1540 = vmatmul.bf16.vlgmr.msra.gmra.mxu2 %v3436_v60  ;;  %v3040_v7 = vld [vmem:[#allocation6 + $0x14c] sm:$0xf]  ;;  %v2799_v12 = vld [vmem:[#allocation6 + $0x5b8] sm:$0xf0] }
  0xa0   :  { %1588 = vmatpush.bf16.msrb.mxu2 %v2194_v6  ;;  %v3134_v6 = vld [vmem:[#allocation6 + $0x434] sm:$0xf0]  ;;  %v2242_v15 = vor.u32 %v3040_v7, %v2239_v9  ;;  %v3080_v9 = vld [vmem:[#allocation6 + $0x28c] sm:$0xf] }
  0xa1   :  { %1603 = vmatpush.bf16.msrb.mxu0 %v2306_v24  ;;  %v2606_v14 = vor.u32 %v3134_v6, %v2605_v5  ;;  %v2447_v24 = vld [vmem:[#allocation6 + $0x2f8] sm:$0xf0]  ;;  %v3148_v5 = vld [vmem:[#allocation6 + $0x4ac] sm:$0xf] }
  0xa2   :  { %1548 = vmatpush.bf16.msra.mxu1 %v2670_v23  ;;  %v3092_v23 = vld [vmem:[#allocation6 + $0x2ec] sm:$0xf]  ;;  %v2671_v6 = vld [vmem:[#allocation6 + $0x4b8] sm:$0xf0] }
  0xa3   :  { %1561 = vmatpush.bf16.msrb.mxu3 %v2814_v20  ;;  %v3036_v20 = vld [vmem:[#allocation6 + $0x12c] sm:$0xf]  ;;  %v2450_v34 = vor.u32 %v3092_v23, %v2447_v24 }
  0xa4   :  { %1589 = vmatpush.bf16.msrb.mxu2 %v2178_v19  ;;  %v3130_v19 = vld [vmem:[#allocation6 + $0x414] sm:$0xf0]  ;;  %v2226_v30 = vor.u32 %v3036_v20, %v2223_v21  ;;  %v3076_v21 = vld [vmem:[#allocation6 + $0x26c] sm:$0xf] }
  0xa5   :  { %1604 = vmatpush.bf16.msrb.mxu0 %v2290_v36  ;;  %v2590_v29 = vor.u32 %v3130_v19, %v2589_v18  ;;  %v2703_v36 = vld [vmem:[#allocation6 + $0x4f8] sm:$0xf0]  ;;  %v3144_v18 = vld [vmem:[#allocation6 + $0x48c] sm:$0xf] }
  0xa6   :  { %1549 = vmatpush.bf16.msra.mxu1 %v2654_v35  ;;  %v3156_v35 = vld [vmem:[#allocation6 + $0x4ec] sm:$0xf]  ;;  %v2655_v19 = vld [vmem:[#allocation6 + $0x498] sm:$0xf0] }
  0xa7   :  { %1562 = vmatpush.bf16.msrb.mxu3 %v2798_v32  ;;  %v3124_v32 = vld [vmem:[#allocation6 + $0x3ec] sm:$0xf]  ;;  %v2706_v48 = vor.u32 %v3156_v35, %v2703_v36 }
  0xa8   :  { %1590 = vmatpush.bf16.msrb.mxu2 %v2162_v31  ;;  %2853 = vmatmul.msk.bf16.vlgmr.msra.gmra.mxu0 %vm1290_vm0, %v3444_v50  ;;  %v3162_v31 = vld [vmem:[#allocation6 + $0x514] sm:$0xf0]  ;;  %v2578_v47 = vor.u32 %v3124_v32, %v2575_v33  ;;  %v3176_v23 = vld [vmem:[#allocation6 + $0x58c] sm:$0xf] }
  0xa9   :  { %1605 = vmatpush.bf16.msrb.mxu0 %v2274_v51  ;;  %v2718_v44 = vor.u32 %v3162_v31, %v2717_v26  ;;  %v2434_v51 = vor.u32 %v3088_v38, %v2431_v40  ;;  %v3108_v26 = vld [vmem:[#allocation6 + $0x36c] sm:$0xf]  ;;  %v2495_v40 = vld [vmem:[#allocation6 + $0x358] sm:$0xf0] }
  0xaa   :  { %1550 = vmatpush.bf16.msra.mxu1 %v2638_v49  ;;  %v3120_v49 = vld [vmem:[#allocation6 + $0x3cc] sm:$0xf]  ;;  %v2514_v35 = vor.u32 %v3108_v26, %v2511_v28 }
  0xab   :  { %1563 = vmatpush.bf16.msrb.mxu3 %v2782_v46  ;;  %v2831_v46 = vld [vmem:[#allocation6 + $0x5f8] sm:$0xf0]  ;;  %v2562_v0 = vor.u32 %v3120_v49, %v2559_v53  ;;  %v3072_v32 = vld [vmem:[#allocation6 + $0x24c] sm:$0xf] }
  0xac   :  { %1591 = vmatpush.bf16.msrb.mxu2 %v2146_v45  ;;  %v3188_v45 = vld [vmem:[#allocation6 + $0x5ec] sm:$0xf] }
  0xad   :  { %1606 = vmatpush.bf16.msrb.mxu0 %v2258_v2  ;;  %v2834_v58 = vor.u32 %v3188_v45, %v2831_v46  ;;  %v3116_v2 = vld [vmem:[#allocation6 + $0x3ac] sm:$0xf]  ;;  %v2351_v46 = vld [vmem:[#allocation6 + $0x238] sm:$0xf0] }
  0xae   :  { %1551 = vmatpush.bf16.msra.mxu1 %v2622_v1  ;;  %v2690_v1 = vor.u32 %v3152_v56, %v2687_v57  ;;  %v2546_v13 = vor.u32 %v3116_v2, %v2543_v4  ;;  %v3172_v33 = vld [vmem:[#allocation6 + $0x56c] sm:$0xf]  ;;  %v2479_v56 = vld [vmem:[#allocation6 + $0x338] sm:$0xf0] }
  0xaf   :  { %1564 = vmatpush.bf16.msrb.mxu3 %v2766_v62  ;;  %v3184_v62 = vld [vmem:[#allocation6 + $0x5cc] sm:$0xf]  ;;  %v2847_v2 = vld [vmem:[#allocation6 + $0x618] sm:$0xf0] }
  0xb0   :  { %1592 = vmatpush.bf16.msrb.mxu2 %v2130_v61  ;;  %v2415_v61 = vld [vmem:[#allocation6 + $0x2b8] sm:$0xf0]  ;;  %v2818_v7 = vor.u32 %v3184_v62, %v2815_v63  ;;  %v3104_v38 = vld [vmem:[#allocation6 + $0x34c] sm:$0xf] }
  0xb1   :  { %1607 = vmatpush.bf16.msrb.mxu0 %v2242_v15  ;;  %v2418_v3 = vor.u32 %v3084_v59, %v2415_v61  ;;  %v3112_v15 = vld [vmem:[#allocation6 + $0x38c] sm:$0xf]  ;;  %v2498_v49 = vor.u32 %v3104_v38, %v2495_v40  ;;  %v2335_v62 = vld [vmem:[#allocation6 + $0x218] sm:$0xf0] }
  0xb2   :  { %1552 = vmatpush.bf16.msra.mxu1 %v2606_v14  ;;  %v2674_v14 = vor.u32 %v3148_v5, %v2671_v6  ;;  %v2530_v24 = vor.u32 %v3112_v15, %v2527_v17  ;;  %v3068_v45 = vld [vmem:[#allocation6 + $0x22c] sm:$0xf]  ;;  %v3210_v40 = vld [vmem:[#allocation9 + $0x58] sm:$0xff] }
  0xb3   :  { %1565 = vmatpush.bf16.msrb.mxu3 %v2750_v11  ;;  %v3180_v11 = vld [vmem:[#allocation6 + $0x5ac] sm:$0xf]  ;;  %v2354_v53 = vor.u32 %v3068_v45, %v2351_v46  ;;  %v3201_v45 = vld [vmem:[#allocation9 + $0x10] sm:$0xff] }
  0xb4   :  { %1593 = vmatpush.bf16.msrb.mxu2 %v2114_v10  ;;  %v2399_v10 = vld [vmem:[#allocation6 + $0x298] sm:$0xf0]  ;;  %v2802_v20 = vor.u32 %v3180_v11, %v2799_v12  ;;  %v3132_v57 = vld [vmem:[#allocation6 + $0x42c] sm:$0xf]  ;;  %v3209_v46 = vld [vmem:[#allocation9 + $0x50] sm:$0xff] }
  0xb5   :  { %1608 = vmatpush.bf16.msrb.mxu0 %v2226_v30  ;;  %v2402_v16 = vor.u32 %v3080_v9, %v2399_v10  ;;  %v2639_v30 = vld [vmem:[#allocation6 + $0x478] sm:$0xf0]  ;;  %v3064_v61 = vld [vmem:[#allocation6 + $0x20c] sm:$0xf] }
  0xb6   :  { %1553 = vmatpush.bf16.msra.mxu1 %v2590_v29  ;;  %v3140_v29 = vld [vmem:[#allocation6 + $0x46c] sm:$0xf]  ;;  %v2338_v5 = vor.u32 %v3064_v61, %v2335_v62  ;;  %v2591_v11 = vld [vmem:[#allocation6 + $0x418] sm:$0xf0] }
  0xb7   :  { %1566 = vmatpush.bf16.msrb.mxu3 %v2734_v25  ;;  %v2658_v25 = vor.u32 %v3144_v18, %v2655_v19  ;;  %v2642_v36 = vor.u32 %v3140_v29, %v2639_v30  ;;  %v3164_v63 = vld [vmem:[#allocation6 + $0x52c] sm:$0xf] }
  0xb8   :  { %1594 = vmatpush.bf16.msrb.mxu2 %v2098_v22  ;;  %v2383_v22 = vld [vmem:[#allocation6 + $0x278] sm:$0xf0]  ;;  %v3096_v6 = vld [vmem:[#allocation6 + $0x30c] sm:$0xf]  ;;  %v1303_v19 = vpop.f32.mrf.mxu0 }
  0xb9   :  { %1554 = vmatmul.bf16.vlgmr.msra.gmra.mxu1 %v3448_v37  ;;  %1609 = vmatpush.bf16.msrb.mxu0 %v2210_v52  ;;  %v2386_v27 = vor.u32 %v3076_v21, %v2383_v22  ;;  %v3100_v52 = vld [vmem:[#allocation6 + $0x32c] sm:$0xf] }
  0xba   :  { %1616 = vmatpush.bf16.msrb.mxu1 %v2450_v34  ;;  %v2767_v34 = vld [vmem:[#allocation6 + $0x578] sm:$0xf0]  ;;  %v3128_v10 = vld [vmem:[#allocation6 + $0x40c] sm:$0xf] }
  0xbb   :  { %1567 = vmatpush.bf16.msrb.mxu3 %v2718_v44  ;;  %v2770_v44 = vor.u32 %v3172_v33, %v2767_v34  ;;  %v3204_v29 = vld [vmem:[#allocation9 + $0x28] sm:$0xff]  ;;  %v3211_v33 = vld [vmem:[#allocation9 + $0x60] sm:$0xff] }
  0xbc   :  { %1595 = vmatpush.bf16.msrb.mxu2 %v2082_v39  ;;  %1610 = vmatmul.bf16.vlgmr.msrb.gmra.mxu0 %v3440_v8  ;;  %v2367_v8 = vld [vmem:[#allocation6 + $0x258] sm:$0xf0]  ;;  %v1317_v22 = vpop.f32.mrf.mxu1  ;;  %v3212_v30 = vld [vmem:[#allocation9 + $0x68] sm:$0xff] }
  0xbd   :  { %1658 = vmatpush.bf16.msra.mxu0 %v2834_v58  ;;  %v2370_v39 = vor.u32 %v3072_v32, %v2367_v8  ;;  %v2607_v58 = vld [vmem:[#allocation6 + $0x438] sm:$0xf0]  ;;  %v1331_v17 = vpop.f32.mrf.mxu2  ;;  %v3203_v8 = vld [vmem:[#allocation9 + $0x20] sm:$0xff] }
  0xbe   :  { %1617 = vmatpush.bf16.msrb.mxu1 %v2434_v51  ;;  %1568 = vmatmul.bf16.vlgmr.msrb.gmra.mxu3 %v3450_v42  ;;  %v2626_v51 = vor.u32 %v3136_v41, %v2623_v43  ;;  %v2610_v4 = vor.u32 %v3132_v57, %v2607_v58 }
  0xbf   :  { %1630 = vmatpush.bf16.msra.mxu3 %v2578_v47  ;;  %1596 = vmatmul.bf16.vlgmr.msrb.gmra.mxu2 %v3434_v55  ;;  %v2783_v55 = vld [vmem:[#allocation6 + $0x598] sm:$0xf0]  ;;  %v3168_v47 = vld [vmem:[#allocation6 + $0x54c] sm:$0xf] }
  0xc0   :  { %1644 = vmatpush.bf16.msra.mxu2 %v2706_v48  ;;  %v2786_v31 = vor.u32 %v3176_v23, %v2783_v55  ;;  %v2751_v48 = vld [vmem:[#allocation6 + $0x558] sm:$0xf0] }
  0xc1   :  { %1659 = vmatpush.bf16.msra.mxu0 %v2818_v7  ;;  %v2754_v59 = vor.u32 %v3168_v47, %v2751_v48  ;;  %v2463_v7 = vld [vmem:[#allocation6 + $0x318] sm:$0xf0] }
  0xc2   :  { %1618 = vmatpush.bf16.msrb.mxu1 %v2418_v3  ;;  %v2482_v3 = vor.u32 %v3100_v52, %v2479_v56  ;;  %v2466_v15 = vor.u32 %v3096_v6, %v2463_v7  ;;  %v3208_v56 = vld [vmem:[#allocation9 + $0x48] sm:$0xff] }
  0xc3   :  { %1631 = vmatpush.bf16.msra.mxu3 %v2562_v0  ;;  %v2735_v0 = vld [vmem:[#allocation6 + $0x538] sm:$0xf0] }
  0xc4   :  { %1645 = vmatpush.bf16.msra.mxu2 %v2690_v1  ;;  %v3192_v1 = vld [vmem:[#allocation6 + $0x60c] sm:$0xf]  ;;  %v2738_v9 = vor.u32 %v3164_v63, %v2735_v0  ;;  %v3199_v0 = vld [vmem:[#allocation9] sm:$0xff] }
  0xc5   :  { %1660 = vmatpush.bf16.msra.mxu0 %v2802_v20  ;;  %v2850_v12 = vor.u32 %v3192_v1, %v2847_v2  ;;  %v1345_v20 = vpop.f32.mrf.mxu3  ;;  %v3476_v21 = vpop.f32.mrf.mxu2  ;;  %v3207_v1 = vld [vmem:[#allocation9 + $0x40] sm:$0xff] }
  0xc6   :  { %1619 = vmatpush.bf16.msrb.mxu1 %v2402_v16  ;;  %v2594_v16 = vor.u32 %v3128_v10, %v2591_v11 }
  0xc7   :  { %1632 = vmatpush.bf16.msra.mxu3 %v2546_v13  ;;  %v3160_v13 = vld [vmem:[#allocation6 + $0x50c] sm:$0xf] }
  0xc8   :  { %1646 = vmatpush.bf16.msra.mxu2 %v2674_v14  ;;  %v2719_v14 = vld [vmem:[#allocation6 + $0x518] sm:$0xf0] }
  0xc9   :  { %1661 = vmatpush.bf16.msra.mxu0 %v2786_v31  ;;  %v2722_v18 = vor.u32 %v3160_v13, %v2719_v14  ;;  %v3486_v31 = vld [vmem:[#allocation8] sm:$0xf] }
  0xca   :  { %1620 = vmatpush.bf16.msrb.mxu1 %v2386_v27  ;;  %v302_v32 = vperm.slane %v3486_v31, 0  ;;  %v303_v41 = vperm.slane %v3486_v31, 1 }
  0xcb   :  { %1633 = vmatpush.bf16.msra.mxu3 %v2530_v24  ;;  %v3206_v24 = vld [vmem:[#allocation9 + $0x38] sm:$0xff] }
  0xcc   :  { %1647 = vmatpush.bf16.msra.mxu2 %v2658_v25  ;;  %v3214_v25 = vld [vmem:[#allocation9 + $0x78] sm:$0xff]  ;;  %v1304_v38 = vadd.f32 %v1303_v19, %v302_v32 }
  0xcd   :  { %1662 = vmatpush.bf16.msra.mxu0 %v2770_v44  ;;  %v3478_v23 = vpop.f32.mrf.mxu2  ;;  %v3482_v55 = vpop.f32.mrf.mxu3 }
  0xce   :  { %1621 = vmatpush.bf16.msrb.mxu1 %v2370_v39  ;;  %v3202_v39 = vld [vmem:[#allocation9 + $0x18] sm:$0xff]  ;;  %v1318_v44 = vadd.f32 %v1317_v22, %v1304_v38 }
  0xcf   :  { %1634 = vmatpush.bf16.msra.mxu3 %v2514_v35 }
  0xd0   :  { %1648 = vmatpush.bf16.msra.mxu2 %v2642_v36 }
  0xd1   :  { %1663 = vmatpush.bf16.msra.mxu0 %v2754_v59 }
  0xd2   :  { %1622 = vmatpush.bf16.msrb.mxu1 %v2354_v53  ;;  %v3200_v53 = vld [vmem:[#allocation9 + $0x8] sm:$0xff] }
  0xd3   :  { %1635 = vmatpush.bf16.msra.mxu3 %v2498_v49 }
  0xd4   :  { %1649 = vmatpush.bf16.msra.mxu2 %v2626_v51  ;;  %v1332_v51 = vadd.f32 %v1331_v17, %v1318_v44  ;;  %v3222_v44 = vld [vmem:[#allocation9 + $0xb8] sm:$0xff] }
  0xd5   :  { %1664 = vmatpush.bf16.msra.mxu0 %v2738_v9  ;;  %v3484_v27 = vpop.f32.mrf.mxu2 }
  0xd6   :  { %1623 = vmatpush.bf16.msrb.mxu1 %v2338_v5  ;;  %v1346_v61 = vadd.f32 %v1345_v20, %v1332_v51 }
  0xd7   :  { %1636 = vmatpush.bf16.msra.mxu3 %v2482_v3 }
  0xd8   :  { %1650 = vmatpush.bf16.msra.mxu2 %v2610_v4 }
  0xd9   :  { %1624 = vmatmul.bf16.vlgmr.msrb.gmra.mxu1 %v3432_v54  ;;  %1665 = vmatpush.bf16.msra.mxu0 %v2722_v18  ;;  %v1305_v54 = vpop.f32.mrf.mxu0 }
  0xda   :  { %1679 = vmatpush.bf16.msra.mxu1 %v2850_v12  ;;  %v1306_v52 = vadd.f32 %v1305_v54, %v302_v32 }
  0xdb   :  { %1637 = vmatpush.bf16.msra.mxu3 %v2466_v15 }
  0xdc   :  { %1651 = vmatpush.bf16.msra.mxu2 %v2594_v16  ;;  %1666 = vmatmul.bf16.vlgmr.msra.gmra.mxu0 %v3450_v42  ;;  %v3213_v42 = vld [vmem:[#allocation9 + $0x70] sm:$0xff] }
  0xdd   :  { %v1401_v28 = vpop.f32.mrf.mxu3 }
  0xde   :  { %1638 = vmatmul.bf16.vlgmr.msra.gmra.mxu3 %v3436_v60  ;;  %v1319_v60 = vpop.f32.mrf.mxu1  ;;  %2000 = vmatpush.bf16.msrb.mxu1 %v3214_v25  ;;  %v1402_v47 = vadd.f32 %v1401_v28, %v303_v41 }
  0xdf   :  { %1652 = vmatmul.bf16.vlgmr.msra.gmra.mxu2 %v3448_v37  ;;  %1986 = vmatpush.bf16.msrb.mxu3 %v3206_v24  ;;  %v3205_v37 = vld [vmem:[#allocation9 + $0x30] sm:$0xff]  ;;  %v1320_v62 = vadd.f32 %v1319_v60, %v1306_v52 }
  0xe0   :  { %2014 = vmatpush.bf16.msrb.mxu2 %v3222_v44 }
  0xe1   :  { %v1359_v26 = vpop.f32.mrf.mxu0  ;;  %v1334_v5 = vadd.f32 %v3476_v21, %v1320_v62 }
  0xe2   :  { %2001 = vmatpush.bf16.msrb.mxu1 %v3213_v42  ;;  %v1415_v35 = vpop.f32.mrf.mxu2  ;;  %v1360_v2 = vadd.f32 %v1359_v26, %v1346_v61 }
  0xe3   :  { %1987 = vmatpush.bf16.msrb.mxu3 %v3205_v37  ;;  %v1416_v58 = vadd.f32 %v1415_v35, %v1402_v47  ;;  %v1348_v13 = vadd.f32 %v3482_v55, %v1334_v5  ;;  %v3221_v47 = vld [vmem:[#allocation9 + $0xb0] sm:$0xff] }
  0xe4   :  { %2015 = vmatpush.bf16.msrb.mxu2 %v3221_v47  ;;  %v3217_v5 = vld [vmem:[#allocation9 + $0x90] sm:$0xff] }
  0xe5   :  { %v1403_v36 = vpop.f32.mrf.mxu3 }
  0xe6   :  { %2002 = vmatpush.bf16.msrb.mxu1 %v3212_v30  ;;  %v1404_v3 = vadd.f32 %v1403_v36, %v303_v41 }
  0xe7   :  { %1988 = vmatpush.bf16.msrb.mxu3 %v3204_v29 }
  0xe9   :  { %2854 = vmatmul.msk.bf16.vlgmr.msra.gmra.mxu1 %vm1290_vm0, %v3444_v50  ;;  %v1373_v50 = vpop.f32.mrf.mxu1  ;;  %v1361_v34 = vpop.f32.mrf.mxu0 }
  0xea   :  { %2003 = vmatpush.bf16.msrb.mxu1 %v3211_v33  ;;  %v1417_v57 = vpop.f32.mrf.mxu2  ;;  %v1374_v10 = vadd.f32 %v1373_v50, %v1360_v2  ;;  %v1362_v17 = vadd.f32 %v1361_v34, %v1348_v13  ;;  %v3226_v2 = vld [vmem:[#allocation9 + $0xd8] sm:$0xff] }
  0xeb   :  { %1989 = vmatpush.bf16.msrb.mxu3 %v3203_v8  ;;  %v1418_v11 = vadd.f32 %v1417_v57, %v1404_v3  ;;  %v3219_v57 = vld [vmem:[#allocation9 + $0xa0] sm:$0xff] }
  0xec   :  { %v1388_v16 = vadd.f32 %v3478_v23, %v1374_v10  ;;  %v3224_v10 = vld [vmem:[#allocation9 + $0xc8] sm:$0xff] }
  0xee   :  { %2004 = vmatpush.bf16.msrb.mxu1 %v3210_v40  ;;  %v1686_v54 = vmax.f32 %v1388_v16, 0.0 }
  0xef   :  { %1990 = vmatpush.bf16.msrb.mxu3 %v3202_v39 }
  0xf1   :  { %v1375_v43 = vpop.f32.mrf.mxu1 }
  0xf2   :  { %2005 = vmatpush.bf16.msrb.mxu1 %v3209_v46  ;;  %v1376_v24 = vadd.f32 %v1375_v43, %v1362_v17 }
  0xf3   :  { %1991 = vmatpush.bf16.msrb.mxu3 %v3201_v45  ;;  %v3230_v45 = vld [vmem:[#allocation9 + $0xf8] sm:$0xff] }
  0xf4   :  { %v1390_v42 = vadd.f32 %v3484_v27, %v1376_v24  ;;  %2028 = vmatpush.bf16.msrb.mxu0 %v3230_v45 }
  0xf5   :  { %v1429_v48 = vpop.f32.mrf.mxu0 }
  0xf6   :  { %2006 = vmatpush.bf16.msrb.mxu1 %v3208_v56  ;;  %v1430_v63 = vadd.f32 %v1429_v48, %v1416_v58  ;;  %v1690_v29 = vmax.f32 %v1390_v42, 0.0  ;;  %v3229_v48 = vld [vmem:[#allocation9 + $0xf0] sm:$0xff]  ;;  %v3228_v56 = vld [vmem:[#allocation9 + $0xe8] sm:$0xff]  ;;  %v3227_v58 = vld [vmem:[#allocation9 + $0xe0] sm:$0xff] }
  0xf7   :  { %1992 = vmatpush.bf16.msrb.mxu3 %v3200_v53  ;;  %v3220_v53 = vld [vmem:[#allocation9 + $0xa8] sm:$0xff] }
  0xf8   :  { %2029 = vmatpush.bf16.msrb.mxu0 %v3229_v48  ;;  %2016 = vmatpush.bf16.msrb.mxu2 %v3220_v53 }
  0xf9   :  { %v1443_v59 = vpop.f32.mrf.mxu1 }
  0xfa   :  { %2007 = vmatpush.bf16.msrb.mxu1 %v3207_v1  ;;  %v1444_v6 = vadd.f32 %v1443_v59, %v1430_v63  ;;  %v304_v59 = vperm.slane %v3486_v31, 2  ;;  %v3218_v1 = vld [vmem:[#allocation9 + $0x98] sm:$0xff] }
  0xfb   :  { %1993 = vmatpush.bf16.msrb.mxu3 %v3199_v0 }
  0xfc   :  { %2030 = vmatpush.bf16.msrb.mxu0 %v3228_v56  ;;  %2017 = vmatpush.bf16.msrb.mxu2 %v3219_v57 }
  0xfd   :  { %v1457_v49 = vpop.f32.mrf.mxu3  ;;  %v1431_v7 = vpop.f32.mrf.mxu0 }
  0xfe   :  { %v1458_v12 = vadd.f32 %v1457_v49, %v1444_v6  ;;  %v1432_v14 = vadd.f32 %v1431_v7, %v1418_v11  ;;  %v3225_v6 = vld [vmem:[#allocation9 + $0xd0] sm:$0xff] }
 0x100   :  { %2031 = vmatpush.bf16.msrb.mxu0 %v3227_v58  ;;  %2018 = vmatpush.bf16.msrb.mxu2 %v3218_v1 }
 0x101   :  { %v1445_v15 = vpop.f32.mrf.mxu1 }
 0x102   :  { %v1471_v9 = vpop.f32.mrf.mxu2  ;;  %v1446_v20 = vadd.f32 %v1445_v15, %v1432_v14 }
 0x103   :  { %v1472_v18 = vadd.f32 %v1471_v9, %v1458_v12  ;;  %v3216_v9 = vld [vmem:[#allocation9 + $0x88] sm:$0xff] }
 0x104   :  { %2032 = vmatpush.bf16.msrb.mxu0 %v3226_v2  ;;  %2019 = vmatpush.bf16.msrb.mxu2 %v3217_v5 }
 0x105   :  { %v1459_v4 = vpop.f32.mrf.mxu3 }
 0x106   :  { %v1460_v21 = vadd.f32 %v1459_v4, %v1446_v20  ;;  %v305_v4 = vperm.slane %v3486_v31, 3 }
 0x108   :  { %2033 = vmatpush.bf16.msrb.mxu0 %v3225_v6  ;;  %2020 = vmatpush.bf16.msrb.mxu2 %v3216_v9 }
 0x10a   :  { %v1473_v60 = vpop.f32.mrf.mxu2 }
 0x10b   :  { %v1474_v26 = vadd.f32 %v1473_v60, %v1460_v21 }
 0x10c   :  { %2034 = vmatpush.bf16.msrb.mxu0 %v3224_v10 }
 0x10d   :  { %v1485_v19 = vpop.f32.mrf.mxu3 }
 0x10e   :  { %v1486_v22 = vadd.f32 %v1485_v19, %v1472_v18  ;;  %v3215_v18 = vld [vmem:[#allocation9 + $0x80] sm:$0xff] }
 0x10f   :  { %v3223_v19 = vld [vmem:[#allocation9 + $0xc0] sm:$0xff]  ;;  %2021 = vmatpush.bf16.msrb.mxu2 %v3215_v18 }
 0x110   :  { %v1687_v25 = vmax.f32 %v1486_v22, 0.0  ;;  %2035 = vmatpush.bf16.msrb.mxu0 %v3223_v19 }
 0x112   :  { %v1694_v37 = vpack.c.bf16 %v1687_v25, %v1686_v54 }
 0x114   :  { %1698 = vst [vmem:[#allocation2] sm:$0xff] %v1694_v37 }
 0x115   :  { %v1487_v55 = vpop.f32.mrf.mxu3  ;;  %v1527_v50 = vpop.f32.mrf.mxu0 }
 0x116   :  { %v1488_v28 = vadd.f32 %v1487_v55, %v1474_v26  ;;  %v1499_v27 = vpop.f32.mrf.mxu1 }
 0x117   :  { %v1500_v3 = vadd.f32 %v1499_v27, %v304_v59 }
 0x118   :  { %v1691_v30 = vmax.f32 %v1488_v28, 0.0 }
 0x11a   :  { %v1696_v23 = vpack.c.bf16 %v1691_v30, %v1690_v29 }
 0x11b   :  { %v2857_v32 = vld [vmem:[#allocation2] sm:$0xf]  ;;  %v3195_v33 = vld [vmem:[#allocation2 + $0x4] sm:$0xf] }
 0x11c   :  { %1700 = vst [vmem:[#allocation2 + $0x10] sm:$0xff] %v1696_v23 }
 0x11d   :  { %v3494_v38 = vpop.f32.mrf.mxu0 }
 0x11e   :  { %v1501_v43 = vpop.f32.mrf.mxu1 }
 0x11f   :  { %v1502_v17 = vadd.f32 %v1501_v43, %v304_v59 }
 0x121   :  { %v1513_v40 = vpop.f32.mrf.mxu3 }
 0x122   :  { %v1541_v41 = vpop.f32.mrf.mxu2  ;;  %v1514_v7 = vadd.f32 %v1513_v40, %v1500_v3 }
 0x123   :  { %v3197_v8 = vld [vmem:[#allocation2 + $0xc] sm:$0xf0]  ;;  %v2859_v34 = vld [vmem:[#allocation2 + $0x10] sm:$0xf0] }
 0x124   :  { %v2858_v35 = vor.u32 %v3197_v8, %v2857_v32  ;;  %v2862_v36 = vor.u32 %v3195_v33, %v2859_v34  ;;  %v1528_v16 = vadd.f32 %v1527_v50, %v1514_v7 }
 0x125   :  { %v3496_v39 = vpop.f32.mrf.mxu0 }
 0x126   :  { %1994 = vmatmul.bf16.vlgmr.msrb.gmra.mxu3 %v2858_v35  ;;  %2008 = vmatmul.bf16.vlgmr.msrb.gmra.mxu1 %v2862_v36  ;;  %v1542_v31 = vadd.f32 %v1541_v41, %v1528_v16 }
 0x129   :  { %v1515_v51 = vpop.f32.mrf.mxu3 }
 0x12a   :  { %v1543_v52 = vpop.f32.mrf.mxu2  ;;  %v1516_v22 = vadd.f32 %v1515_v51, %v1502_v17 }
 0x12c   :  { %v1530_v26 = vadd.f32 %v3494_v38, %v1516_v22 }
 0x12d   :  { %v3498_v46 = vpop.f32.mrf.mxu0 }
 0x12e   :  { %v1544_v50 = vadd.f32 %v1543_v52, %v1530_v26 }
 0x136   :  { %v1555_v49 = vpop.f32.mrf.mxu1 }
 0x137   :  { %v1556_v21 = vadd.f32 %v1555_v49, %v1542_v31 }
 0x139   :  { %v1611_v62 = vpop.f32.mrf.mxu0 }
 0x13e   :  { %v1557_v63 = vpop.f32.mrf.mxu1 }
 0x13f   :  { %v1558_v34 = vadd.f32 %v1557_v63, %v1544_v50 }
 0x141   :  { %v1569_v61 = vpop.f32.mrf.mxu3  ;;  %v1613_v14 = vpop.f32.mrf.mxu0 }
 0x142   :  { %v1597_v0 = vpop.f32.mrf.mxu2  ;;  %v1570_v55 = vadd.f32 %v1569_v61, %v1556_v21 }
 0x143   :  { %v1598_v11 = vadd.f32 %v1597_v0, %v305_v4 }
 0x144   :  { %v1584_v32 = vadd.f32 %v3496_v39, %v1570_v55 }
 0x145   :  { %v1612_v20 = vadd.f32 %v1611_v62, %v1598_v11 }
 0x146   :  { %v1688_v40 = vmax.f32 %v1584_v32, 0.0 }
 0x149   :  { %v1571_v13 = vpop.f32.mrf.mxu3 }
 0x14a   :  { %v1599_v15 = vpop.f32.mrf.mxu2  ;;  %v1572_v41 = vadd.f32 %v1571_v13, %v1558_v34 }
 0x14b   :  { %v1600_v60 = vadd.f32 %v1599_v15, %v305_v4 }
 0x14c   :  { %v1586_v49 = vadd.f32 %v3498_v46, %v1572_v41  ;;  %v3247_v46 = vld [vmem:[%s3518_s4] ss:$0 sm:$0xff] }
 0x14d   :  { %v1614_v30 = vadd.f32 %v1613_v14, %v1600_v60 }
 0x14e   :  { %v1692_v39 = vmax.f32 %v1586_v49, 0.0 }
 0x156   :  { %v1625_v12 = vpop.f32.mrf.mxu1 }
 0x157   :  { %v1626_v54 = vadd.f32 %v1625_v12, %v1612_v20 }
 0x159   :  { %v1667_v28 = vpop.f32.mrf.mxu0 }
 0x15e   :  { %v1627_v24 = vpop.f32.mrf.mxu1 }
 0x15f   :  { %v1628_v8 = vadd.f32 %v1627_v24, %v1614_v30 }
 0x161   :  { %v1639_v25 = vpop.f32.mrf.mxu3  ;;  %v1669_v38 = vpop.f32.mrf.mxu0 }
 0x162   :  { %v1640_v37 = vadd.f32 %v1639_v25, %v1626_v54  ;;  %v1653_v42 = vpop.f32.mrf.mxu2 }
 0x164   :  { %v1654_v29 = vadd.f32 %v1653_v42, %v1640_v37 }
 0x166   :  { %v1668_v23 = vadd.f32 %v1667_v28, %v1654_v29  ;;  %v1681_v33 = vpop.f32.mrf.mxu1 }
 0x168   :  { %v1682_v35 = vadd.f32 %v1681_v33, %v1668_v23 }
 0x169   :  { %v1641_v36 = vpop.f32.mrf.mxu3 }
 0x16a   :  { %v1642_v27 = vadd.f32 %v1641_v36, %v1628_v8  ;;  %v1689_v43 = vmax.f32 %v1682_v35, 0.0  ;;  %v1655_v44 = vpop.f32.mrf.mxu2 }
 0x16c   :  { %v1656_v45 = vadd.f32 %v1655_v44, %v1642_v27  ;;  %v1695_v47 = vpack.c.bf16 %v1689_v43, %v1688_v40 }
 0x16e   :  { %v1670_v48 = vadd.f32 %v1669_v38, %v1656_v45  ;;  %1699 = vst [vmem:[#allocation2 + $0x8] sm:$0xff] %v1695_v47  ;;  %v1683_v51 = vpop.f32.mrf.mxu1 }
 0x170   :  { %v1684_v52 = vadd.f32 %v1683_v51, %v1670_v48 }
 0x172   :  { %v1693_v53 = vmax.f32 %v1684_v52, 0.0 }
 0x174   :  { %v1697_v56 = vpack.c.bf16 %v1693_v53, %v1692_v39 }
 0x175   :  { %v2865_v57 = vld [vmem:[#allocation2 + $0x8] sm:$0xf]  ;;  %v3196_v59 = vld [vmem:[#allocation2 + $0xc] sm:$0xf] }
 0x176   :  { %1701 = vst [vmem:[#allocation2 + $0x18] sm:$0xff] %v1697_v56 }
 0x17d   :  { %v3198_v58 = vld [vmem:[#allocation2 + $0x14] sm:$0xf0]  ;;  %v2867_v61 = vld [vmem:[#allocation2 + $0x18] sm:$0xf0] }
 0x17e   :  { %v2866_v62 = vor.u32 %v3198_v58, %v2865_v57  ;;  %v2870_v63 = vor.u32 %v3196_v59, %v2867_v61 }
 0x180   :  { %2022 = vmatmul.bf16.vlgmr.msrb.gmra.mxu2 %v2866_v62  ;;  %2036 = vmatmul.bf16.vlgmr.msrb.gmra.mxu0 %v2870_v63 }
 0x1a3   :  { %v2009_v1 = vpop.f32.mrf.mxu1 }
 0x1a9   :  { %v1995_v0 = vpop.f32.mrf.mxu3 }
 0x1aa   :  { %v1996_v5 = vadd.f32 %v3247_v46, %v1995_v0 }
 0x1ab   :  { %v2011_v9 = vpop.f32.mrf.mxu1 }
 0x1ac   :  { %v2010_v7 = vadd.f32 %v2009_v1, %v1996_v5 }
 0x1b1   :  { %v1997_v2 = vpop.f32.mrf.mxu3 }
 0x1b2   :  { %v1998_v6 = vadd.f32 %v3247_v46, %v1997_v2 }
 0x1b4   :  { %v2012_v11 = vadd.f32 %v2011_v9, %v1998_v6 }
 0x1fd   :  { %v2037_v3 = vpop.f32.mrf.mxu0 }
 0x203   :  { %v2023_v4 = vpop.f32.mrf.mxu2 }
 0x204   :  { %v2024_v10 = vadd.f32 %v2023_v4, %v2010_v7 }
 0x205   :  { %v2039_v14 = vpop.f32.mrf.mxu0 }
 0x206   :  { %v2038_v15 = vadd.f32 %v2037_v3, %v2024_v10 }
 0x20b   :  { %v2025_v12 = vpop.f32.mrf.mxu2 }
 0x20c   :  { %v2026_v13 = vadd.f32 %v2025_v12, %v2012_v11 }
 0x20e   :  { %v2040_v16 = vadd.f32 %v2039_v14, %v2026_v13 }
 0x210   :  { %v3234_v17 = vpack.c.bf16 %v2040_v16, %v2038_v15 }
 0x212   :  { %3235 = vst [vmem:[#allocation11] sm:$0xff] %v3234_v17  }
 0x213   :  { %2058 = dma.vmem_to_hbm [thread:$0]  %s2051_s18, 128, %s2053_s21, [#allocation5], %s3384_s15, %s3384_s15, %s3385_s16  }
 0x214   :  { %3374 = dma.done.wait [#allocation5], 128  }
 0x215   :  { %3375 = vsyncadd [#allocation5], 4294967168 }
 0x216   :  { %2063 = vsyncpa [#allocation4], 1 }
 0x217   :  { %2064 = vsyncpa [#allocation7], 1 }
 0x218   :  { %2065 = vsyncpa [#allocation10], 1 }
 0x219   :  { %2066 = vsyncpa [#allocation5], 1 }

</bundles_post_ra>
